<compile_context>
chip_gen: v7x
topology: tpu7x:2x2x1
jax: 0.10.0
libtpu: 0.0.40
codegen_flags: <defaults>
</compile_context>

<pallas_src>
import math

import numpy as np
import jax
import jax.numpy as jnp
from jax.experimental import pallas as pl
from jax.experimental.pallas import tpu as pltpu


# ----------------------------- configuration (small demo shapes) -----------------------------
B = 2                      # batch
CIN = 4                    # inp_chans
COUT = 4                   # out_chans
IN_SHAPE = (9, 16)         # (nlat, nlon) before upsampling
OUT_SHAPE = (13, 24)       # (nlat, nlon) after upsampling == conv grid
KERNEL_SHAPE = (3, 3)
BASIS_TYPE = "morlet"
K = KERNEL_SHAPE[0] * KERNEL_SHAPE[1]   # morlet basis size = 9

LANE = 128                 # TPU lane width
MAX_TILES = 2              # at most 2 output column tiles (dual-TC v7x); 1 on single-TC chips
SUBLANE_M = 16             # pad GEMM M dim so bf16 LHS vregs / f32 output stores are sublane-dense


def _compute_cutoff_radius(nlat, kernel_shape, basis_type):
    theta_cutoff_factor = {"piecewise linear": 0.5, "morlet": 0.5, "zernike": math.sqrt(2.0)}
    return (kernel_shape[0] + 1) * theta_cutoff_factor[basis_type] * math.pi / float(nlat - 1)


# ----------------------------- host-side operator construction -----------------------------
def _equiangular_colatitudes(nlat):
    # equiangular grid including both poles: theta_j = j * pi / (nlat - 1)
    return np.linspace(0.0, np.pi, nlat)


def _equiangular_quad_weights(nlat):
    # TODO(synk): torch_harmonics uses Clenshaw-Curtis quadrature weights; trapezoidal sin(theta) here.
    theta = _equiangular_colatitudes(nlat)
    w = np.sin(theta) * (np.pi / (nlat - 1))
    w[0] *= 0.5
    w[-1] *= 0.5
    return w


def _lat_interp_matrix(nlat_in, nlat_out):
    ti = _equiangular_colatitudes(nlat_in)
    to = _equiangular_colatitudes(nlat_out)
    idx = np.clip(np.searchsorted(ti, to, side="right") - 1, 0, nlat_in - 2)
    t = np.clip((to - ti[idx]) / (ti[idx + 1] - ti[idx]), 0.0, 1.0)
    A = np.zeros((nlat_out, nlat_in), np.float64)
    A[np.arange(nlat_out), idx] += 1.0 - t
    A[np.arange(nlat_out), idx + 1] += t
    return A


def _lon_interp_matrix(nlon_in, nlon_out):
    li = 2.0 * np.pi * np.arange(nlon_in) / nlon_in
    lo = 2.0 * np.pi * np.arange(nlon_out) / nlon_out
    d = 2.0 * np.pi / nlon_in
    idx = (np.floor(lo / d).astype(np.int64)) % nlon_in
    t = (lo - li[idx]) / d
    A = np.zeros((nlon_out, nlon_in), np.float64)
    A[np.arange(nlon_out), idx] += 1.0 - t
    A[np.arange(nlon_out), (idx + 1) % nlon_in] += t
    return A


def _resample_matrix(in_shape, out_shape):
    """R[(ho,wo),(hi,wi)] for bilinear ResampleS2 on equiangular grids."""
    alat = _lat_interp_matrix(in_shape[0], out_shape[0])
    alon = _lon_interp_matrix(in_shape[1], out_shape[1])
    return np.kron(alat, alon)          # (Hout*Wout, Hin*Win)


def _morlet_basis_vals(theta, phi, r_cutoff, kernel_shape):
    # TODO(synk): reconstruction of torch_harmonics MorletFilterBasis (Gaussian envelope x separable
    # harmonics on the tangent plane); normalization not bit-exact to the library.
    xs = theta * np.cos(phi) / r_cutoff
    ys = theta * np.sin(phi) / r_cutoff
    mask = (theta <= r_cutoff).astype(np.float64)
    env = np.exp(-0.5 * (theta / (0.5 * r_cutoff)) ** 2) * mask

    def harm(m, t):
        n = (m + 1) // 2
        return np.cos(np.pi * n * t) if m % 2 == 0 else np.sin(np.pi * n * t)

    vals = []
    for mx in range(kernel_shape[0]):
        for my in range(kernel_shape[1]):
            vals.append(env * harm(mx, xs) * harm(my, ys))
    return np.stack(vals, axis=0)       # (K, ...)


def _precompute_disco_psi(conv_shape, kernel_shape, theta_cutoff):
    """psi[k, ho, hi, dlon]: morlet DISCO filter tensor on the conv_shape equiangular grid,
    with input-grid quadrature weights folded in."""
    nlat, nlon = conv_shape
    lats = _equiangular_colatitudes(nlat)
    lons = 2.0 * np.pi * np.arange(nlon) / nlon
    qw = _equiangular_quad_weights(nlat) * (2.0 * np.pi / nlon)

    th_o = lats[:, None, None]          # output colatitude (output longitude fixed at 0)
    th_i = lats[None, :, None]          # input colatitude
    dl = lons[None, None, :]            # relative input longitude

    # rotate the input point into the local frame of the output point (torch_harmonics convention)
    z = np.cos(dl) * np.sin(th_o) * np.sin(th_i) + np.cos(th_o) * np.cos(th_i)
    x = np.cos(th_o) * np.cos(dl) * np.sin(th_i) - np.sin(th_o) * np.cos(th_i)
    y = np.sin(dl) * np.sin(th_i)
    gdist = np.arccos(np.clip(z, -1.0, 1.0))
    phi = np.arctan2(y, x)

    psi = _morlet_basis_vals(gdist, phi, theta_cutoff, kernel_shape)    # (K, Ho, Hi, W)
    psi = psi * qw[None, None, :, None]                                 # quadrature weights (input lat)
    # TODO(synk): torch_harmonics additionally applies _normalize_convolution_tensor_s2.
    return psi


def _unroll_psi_over_longitude(psi):
    """PsiT[k, hi*W+s, ho*W+wo] = psi[k, ho, hi, (s-wo) % W]: the longitudinally-equivariant
    DISCO contraction as a plain matmul per basis function."""
    Kk, Ho, Hi, W = psi.shape
    rel = (np.arange(W)[:, None] - np.arange(W)[None, :]) % W           # (s, wo)
    big = psi[:, :, :, rel]                                             # (K, Ho, Hi, s, wo)
    big = np.transpose(big, (0, 2, 3, 1, 4))                            # (K, Hi, s, Ho, wo)
    return big.reshape(Kk, Hi * W, Ho * W)


def _round_up(n, m):
    return ((n + m - 1) // m) * m


def _pad_to(arr, shape):
    return np.pad(arr, [(0, s - d) for d, s in zip(arr.shape, shape)])


def build_decoder_params(seed=0):
    hout, wout = OUT_SHAPE
    hw = hout * wout
    pin = IN_SHAPE[0] * IN_SHAPE[1]
    theta_cutoff = _compute_cutoff_radius(IN_SHAPE[0], KERNEL_SHAPE, BASIS_TYPE)

    rt = _resample_matrix(IN_SHAPE, OUT_SHAPE).T                        # (Hin*Win, H*W)
    psi = _precompute_disco_psi(OUT_SHAPE, KERNEL_SHAPE, theta_cutoff)  # (K, Ho, Hi, W)
    psit = _unroll_psi_over_longitude(psi)                              # (K, H*W, H*W)

    # conv weight (out_chans, in_chans//groups, kernel_size), deterministic init
    key = jax.random.PRNGKey(seed)
    scale = 1.0 / math.sqrt(CIN * K)
    weight = np.asarray(scale * jax.random.normal(key, (COUT, CIN, K), dtype=jnp.float32),
                        dtype=np.float64)

    # Fold resample + per-basis DISCO contraction + channel mixing + k-sum into ONE operator:
    #   T[(ci,p),(co,n)] = sum_k weight[co,ci,k] * (rt @ psit[k])[p,n]
    rtpsit = np.einsum("pq,kqn->kpn", rt, psit)                         # (K, Hin*Win, H*W)
    t_op = np.einsum("ock,kpn->cpon", weight, rtpsit).reshape(CIN * pin, COUT * hw)

    # zero-pad: contraction dim to a lane multiple, output dim to a multiple of MAX_TILES*LANE
    # so both the 1-tile (v5e/v6e) and 2-tile (v7x) layouts are lane-dense with no ragged tile.
    k_pad = _round_up(CIN * pin, LANE)
    n_pad = _round_up(COUT * hw, MAX_TILES * LANE)
    t_pad = _pad_to(t_op, (k_pad, n_pad))

    # stream the constant operator in bf16 (the kernel is DMA-bound on it); f32 accumulation in-kernel
    params = {"t_op": jnp.asarray(t_pad, dtype=jnp.bfloat16)}
    params_np = {"rt": rt, "psit": psit, "weight": weight}
    return params, params_np


# --------------------------------------- Pallas kernel ---------------------------------------
def _decoder_kernel(x_ref, t_ref, o_ref):
    # one column-tile of the folded GEMM: (M, Kp) bf16 @ (Kp, TN) bf16 -> (M, TN) f32 on the MXU
    o_ref[...] = jnp.dot(x_ref[...], t_ref[...], preferred_element_type=jnp.float32)


def _num_col_tiles():
    # 2 output tiles only on dual-TensorCore chips (v7x family) so the operator DMA splits
    # across cores; single-TC v5e/v6e get 1 tile (extra grid steps are pure ~0.35 us overhead).
    try:
        kind = jax.devices()[0].device_kind.lower()
    except Exception:
        return 1
    return 2 if "7" in kind else 1


def discrete_continuous_decoder_forward(x, params):
    """x: (B, Cin, Hin, Win) NCHW.  Returns (B, Cout, Hout, Wout) in x.dtype."""
    dtype = x.dtype
    b, c, hin, win = x.shape
    hout, wout = OUT_SHAPE
    n_real = COUT * hout * wout
    k_real = c * hin * win

    t_op = params["t_op"]
    k_pad, n_pad = t_op.shape
    n_tiles = _num_col_tiles()
    tn = n_pad // n_tiles                      # lane-dense by construction (n_pad % 256 == 0)

    # amp-disabled region in torch computes in f32; here both GEMM operands are bf16 for the
    # native MXU path with f32 accumulation (T is already bf16, tolerance gate accounts for it).
    m_pad = _round_up(max(b, 1), SUBLANE_M)
    xb = x.astype(jnp.bfloat16).reshape(b, k_real)
    xb = jnp.pad(xb, ((0, m_pad - b), (0, k_pad - k_real)))

    cost = pl.CostEstimate(
        flops=2 * m_pad * k_pad * n_pad,
        transcendentals=0,
        bytes_accessed=m_pad * k_pad * 2 + k_pad * n_pad * 2 + m_pad * n_pad * 4,
    )

    out2 = pl.pallas_call(
        _decoder_kernel,
        out_shape=jax.ShapeDtypeStruct((m_pad, n_pad), jnp.float32),
        grid=(n_tiles,),
        in_specs=[
            pl.BlockSpec((m_pad, k_pad), lambda j: (0, 0)),   # tiny bf16 activation block, revisited
            pl.BlockSpec((k_pad, tn), lambda j: (0, j)),      # streamed bf16 column tiles of T
        ],
        out_specs=pl.BlockSpec((m_pad, tn), lambda j: (0, j)),  # lane-dense (tn % 128 == 0) stores
        compiler_params=pltpu.CompilerParams(
            dimension_semantics=("parallel",),                # disjoint output tiles (dual-TC on v7x)
        ),
        cost_estimate=cost,
    )(xb, t_op)

    out = out2[:b, :n_real].reshape(b, COUT, hout, wout)
    return out.astype(dtype)


# ------------------------------------------ main ------------------------------------------
def _reference_numpy(x, params_np):
    """Pure numpy (float64) reference of the UNFOLDED math (resample -> DISCO -> channel mix),
    validating both the host-side operator folding and the kernel."""
    b, c, hin, win = x.shape
    hout, wout = OUT_SHAPE
    x2 = np.asarray(x, np.float64).reshape(b, c, hin * win)
    u = np.einsum("bcp,pq->bcq", x2, params_np["rt"])          # ResampleS2
    z = np.einsum("bcq,kqn->bkcn", u, params_np["psit"])       # per-basis DISCO contraction
    out = np.einsum("ock,bkcn->bon", params_np["weight"], z)   # channel mixing + k-sum
    return out.reshape(b, COUT, hout, wout)


if __name__ == "__main__":
    params, params_np = build_decoder_params(seed=0)

    key = jax.random.PRNGKey(0)
    x = jax.random.normal(key, (B, CIN, IN_SHAPE[0], IN_SHAPE[1]), dtype=jnp.float32)

    out = discrete_continuous_decoder_forward(x, params)
    out = jax.block_until_ready(out)

    assert out.shape == (B, COUT, OUT_SHAPE[0], OUT_SHAPE[1])
    assert out.dtype == x.dtype

    ref = _reference_numpy(np.asarray(x), params_np)
    rel_err = np.max(np.abs(np.asarray(out, np.float64) - ref)) / (np.max(np.abs(ref)) + 1e-12)
    # both GEMM operands are bf16 (f32 accumulation), so the gate is loose but meaningful
    assert rel_err < 5e-2, f"kernel/reference mismatch, rel_err={rel_err}"

    print("KERNEL_OK")
</pallas_src>

<mosaic_0001>
module attributes {stable_mosaic.version = 11 : i64} {
  func.func @_decoder_kernel(%arg0: i32, %arg1: memref<16x640xbf16, #tpu.memory_space<vmem>>, %arg2: memref<640x1280xbf16, #tpu.memory_space<vmem>>, %arg3: memref<16x1280xf32, #tpu.memory_space<vmem>>) attributes {dimension_semantics = [#tpu.dimension_semantics<parallel>], iteration_bounds = array<i64: 1>, scalar_prefetch = 0 : i64, scratch_operands = 0 : i64, tpu.core_type = #tpu.core_type<tc>, window_params = [{pipeline_mode = #tpu.pipeline_mode<synchronous>, transform_indices = @transform_0, window_bounds = array<i64: 16, 640>}, {transform_indices = @transform_1, window_bounds = array<i64: 640, 1280>}, {transform_indices = @transform_2, window_bounds = array<i64: 16, 1280>}]} {
    %c0 = arith.constant 0 : index
    %c0_0 = arith.constant 0 : index
    %0 = vector.load %arg1[%c0, %c0_0] : memref<16x640xbf16, #tpu.memory_space<vmem>>, vector<16x640xbf16>
    %c0_1 = arith.constant 0 : index
    %c0_2 = arith.constant 0 : index
    %1 = vector.load %arg2[%c0_1, %c0_2] : memref<640x1280xbf16, #tpu.memory_space<vmem>>, vector<640x1280xbf16>
    %cst = arith.constant dense<0.000000e+00> : vector<16x1280xf32>
    %2 = tpu.matmul %0, %1, %cst {dimension_numbers = #tpu.dot_dimension_numbers<[1], [0], [0], [1], [0, 0, 1, 1], [], []>} : vector<16x640xbf16>, vector<640x1280xbf16>, vector<16x1280xf32> -> vector<16x1280xf32>
    %c0_3 = arith.constant 0 : index
    %c0_4 = arith.constant 0 : index
    %3 = vector.load %arg3[%c0_3, %c0_4] : memref<16x1280xf32, #tpu.memory_space<vmem>>, vector<16x1280xf32>
    tpu.vector_store %arg3[%c0_3, %c0_4], %2 {strides = array<i32>} : memref<16x1280xf32, #tpu.memory_space<vmem>>, vector<16x1280xf32>,
    return
  }
  func.func @transform_0(%arg0: i32) -> (i32, i32) {
    %c0_i32 = arith.constant 0 : i32
    %c0_i32_0 = arith.constant 0 : i32
    %c0_i32_1 = arith.constant 0 : i32
    return %c0_i32, %c0_i32_0 : i32, i32
  }
  func.func @transform_1(%arg0: i32) -> (i32, i32) {
    %c0_i32 = arith.constant 0 : i32
    %c0_i32_0 = arith.constant 0 : i32
    return %c0_i32, %arg0 : i32, i32
  }
  func.func @transform_2(%arg0: i32) -> (i32, i32) {
    %c0_i32 = arith.constant 0 : i32
    %c0_i32_0 = arith.constant 0 : i32
    return %c0_i32, %arg0 : i32, i32
  }
}

</mosaic_0001>

<bundles_post_ra>
// kernel: tpu_custom_call.1
= control target key start
LH: loop header
LB: loop body
LE: loop exit
PB: predicated region body
PF: predicated region fallthrough
CT: control target
= control target key end

     0   :  { %7 = vsyncpa [#allocation3], 0  ;;  %s4418_s0 = inlined_call_operand.hbm [shape: bf16[16,640], index: 0, kind: input, shape index: {}]   ;;  %s4419_s1 = inlined_call_operand.hbm [shape: bf16[640,1280], index: 1, kind: input, shape index: {}]   ;;  %s4420_s2 = inlined_call_operand.hbm [shape: f32[16,1280], index: 2, kind: output, shape index: {}]  }
   0x1   :  { %8 = vsyncpa [#allocation6], 0 }
   0x2   :  { %9 = vsyncpa [#allocation4], 0  ;;  %s4295_s9 = smov [#allocation2]   ;;  %s4223_s13 = scalar_lea.hbm %s4418_s0, 640 }
   0x3   :  { %s15_s10 = sshll.u32 %s4295_s9, 4  ;;  %p4224_p0 = scmp.ne.s32.totalorder %s4418_s0, %s4223_s13  ;;  %s16_s10 = int_to_ptr.vmem [resolvable:$true] %s15_s10 }
   0x4   :  { %p4227_p1 = scmp.lt.u32.totalorder %s4223_s13, %s4418_s0 }
   0x6   :  { %p4229_p2 = pnand %p4227_p1, %p4224_p0 }
   0x8   :  { %4232 = shalt.err (!%p4229_p2)
}
   0x9   :  { %s4233_s18 = scalar_lea.vmem %s16_s10, 640  ;;  %p4238_p4 = scmp.lt.s32.totalorder %s16_s10, %s16_s10 }
   0xa   :  { %p4234_p3 = scmp.ne.s32.totalorder %s16_s10, %s4233_s18  ;;  %p4239_p5 = scmp.lt.s32.totalorder %s4233_s18, %s4233_s18 }
   0xc   :  { %p4240_p6 = por %p4239_p5, %p4238_p4 }
   0xe   :  { %p4241_p7 = pnand %p4240_p6, %p4234_p3 }
  0x10   :  { %4244 = shalt.err (!%p4241_p7)
}
  0x11   :  { %s4296_s19 = smov 320   ;;  %s4297_s20 = smov 20  }
  0x12   :  { %21 = dma.hbm_to_vmem [thread:$0]  %s4418_s0, 640, %s16_s10, [#allocation3], %s4296_s19, %s4296_s19, %s4297_s20  }
  0x13   :  { %s4298_s23 = smov [#allocation5]   ;;  %s4245_s27 = scalar_lea.hbm %s4419_s1, 51200 }
  0x14   :  { %s27_s24 = sshll.u32 %s4298_s23, 4  ;;  %p4246_p8 = scmp.ne.s32.totalorder %s4419_s1, %s4245_s27  ;;  %s28_s24 = int_to_ptr.vmem [resolvable:$true] %s27_s24 }
  0x15   :  { %p4249_p9 = scmp.lt.u32.totalorder %s4245_s27, %s4419_s1 }
  0x17   :  { %p4251_p10 = pnand %p4249_p9, %p4246_p8 }
  0x19   :  { %4254 = shalt.err (!%p4251_p10)
}
  0x1a   :  { %s4255_s4 = scalar_lea.vmem %s28_s24, 51200  ;;  %p4260_p12 = scmp.lt.s32.totalorder %s28_s24, %s28_s24 }
  0x1b   :  { %p4256_p11 = scmp.ne.s32.totalorder %s28_s24, %s4255_s4  ;;  %p4261_p13 = scmp.lt.s32.totalorder %s4255_s4, %s4255_s4 }
  0x1d   :  { %p4262_p0 = por %p4261_p13, %p4260_p12 }
  0x1f   :  { %p4263_p1 = pnand %p4262_p0, %p4256_p11 }
  0x21   :  { %4266 = shalt.err (!%p4263_p1)
}
  0x22   :  { %s4299_s0 = smov 640   ;;  %s4300_s5 = smov 40  }
  0x23   :  { %33 = dma.hbm_to_vmem [thread:$0]  %s4419_s1, 51200, %s28_s24, [#allocation6], %s4299_s0, %s4299_s0, %s4300_s5  }
  0x24   :  { %4289 = dma.done.wait [#allocation3], 640  }
  0x25   :  { %4290 = vsyncadd [#allocation3], 4294966656 }
  0x26   :  { %4291 = dma.done.wait [#allocation6], 51200  }
  0x27   :  { %4292 = vsyncadd [#allocation6], 4294916096  ;;  %v3611_v0 = vld [vmem:[#allocation5 + $0x4] ss:$40 sps:$4 sm:$0xff]   ;;  %v3615_v2 = vld [vmem:[#allocation5] ss:$40 sps:$4 sm:$0xff]  }
  0x28   :  { %v3613_v1 = vld [vmem:[#allocation5 + $0x504] ss:$40 sps:$4 sm:$0xff]   ;;  %2473 = vmatprep.subr.bf16.mxu1 %v3611_v0  ;;  %v3616_v3 = vld [vmem:[#allocation5 + $0x500] ss:$40 sps:$4 sm:$0xff]   ;;  %v3617_v4 = vld [vmem:[#allocation5 + $0x54] ss:$40 sps:$4 sm:$0xff]  }
  0x29   :  { %2516 = vmatprep.subr.bf16.mxu0 %v3613_v1  ;;  %2474 = vmatpush1.bf16.msra.mxu1 %v3615_v2  ;;  %v3619_v5 = vld [vmem:[#allocation5 + $0x554] ss:$40 sps:$4 sm:$0xff]   ;;  %v3621_v6 = vld [vmem:[#allocation5 + $0x50] ss:$40 sps:$4 sm:$0xff]   ;;  %v3623_v8 = vld [vmem:[#allocation5 + $0xa4] ss:$40 sps:$4 sm:$0xff]  }
  0x2a   :  { %2517 = vmatpush1.bf16.msra.mxu0 %v3616_v3  ;;  %2475 = vmatprep.subr.bf16.mxu1 %v3617_v4  ;;  %v3622_v7 = vld [vmem:[#allocation5 + $0x550] ss:$40 sps:$4 sm:$0xff]   ;;  %v3625_v9 = vld [vmem:[#allocation5 + $0x5a4] ss:$40 sps:$4 sm:$0xff]   ;;  %v3627_v10 = vld [vmem:[#allocation5 + $0xa0] ss:$40 sps:$4 sm:$0xff]  }
  0x2b   :  { %2518 = vmatprep.subr.bf16.mxu0 %v3619_v5  ;;  %v3628_v11 = vld [vmem:[#allocation5 + $0x5a0] ss:$40 sps:$4 sm:$0xff]   ;;  %v3629_v12 = vld [vmem:[#allocation5 + $0xf4] ss:$40 sps:$4 sm:$0xff]   ;;  %v3633_v14 = vld [vmem:[#allocation5 + $0xf0] ss:$40 sps:$4 sm:$0xff]  }
  0x2c   :  { %v3631_v13 = vld [vmem:[#allocation5 + $0x5f4] ss:$40 sps:$4 sm:$0xff]   ;;  %v3634_v15 = vld [vmem:[#allocation5 + $0x5f0] ss:$40 sps:$4 sm:$0xff]   ;;  %v3635_v16 = vld [vmem:[#allocation5 + $0x144] ss:$40 sps:$4 sm:$0xff]  }
  0x2d   :  { %2476 = vmatpush1.bf16.msra.mxu1 %v3621_v6  ;;  %v3637_v17 = vld [vmem:[#allocation5 + $0x644] ss:$40 sps:$4 sm:$0xff]   ;;  %v3639_v18 = vld [vmem:[#allocation5 + $0x140] ss:$40 sps:$4 sm:$0xff]   ;;  %v3641_v20 = vld [vmem:[#allocation5 + $0x194] ss:$40 sps:$4 sm:$0xff]  }
  0x2e   :  { %2519 = vmatpush1.bf16.msra.mxu0 %v3622_v7  ;;  %2477 = vmatprep.subr.bf16.mxu1 %v3623_v8  ;;  %v3640_v19 = vld [vmem:[#allocation5 + $0x640] ss:$40 sps:$4 sm:$0xff]   ;;  %v3643_v21 = vld [vmem:[#allocation5 + $0x694] ss:$40 sps:$4 sm:$0xff]   ;;  %v3645_v22 = vld [vmem:[#allocation5 + $0x190] ss:$40 sps:$4 sm:$0xff]  }
  0x2f   :  { %2520 = vmatprep.subr.bf16.mxu0 %v3625_v9  ;;  %v3646_v23 = vld [vmem:[#allocation5 + $0x690] ss:$40 sps:$4 sm:$0xff]   ;;  %v3647_v24 = vld [vmem:[#allocation5 + $0x1e4] ss:$40 sps:$4 sm:$0xff]   ;;  %v3651_v26 = vld [vmem:[#allocation5 + $0x1e0] ss:$40 sps:$4 sm:$0xff]  }
  0x30   :  { %v3649_v25 = vld [vmem:[#allocation5 + $0x6e4] ss:$40 sps:$4 sm:$0xff]   ;;  %v3652_v27 = vld [vmem:[#allocation5 + $0x6e0] ss:$40 sps:$4 sm:$0xff]   ;;  %v3653_v28 = vld [vmem:[#allocation5 + $0x234] ss:$40 sps:$4 sm:$0xff]  }
  0x31   :  { %2478 = vmatpush1.bf16.msra.mxu1 %v3627_v10  ;;  %v3655_v29 = vld [vmem:[#allocation5 + $0x734] ss:$40 sps:$4 sm:$0xff]   ;;  %v3657_v30 = vld [vmem:[#allocation5 + $0x230] ss:$40 sps:$4 sm:$0xff]   ;;  %v3659_v32 = vld [vmem:[#allocation5 + $0x284] ss:$40 sps:$4 sm:$0xff]  }
  0x32   :  { %2521 = vmatpush1.bf16.msra.mxu0 %v3628_v11  ;;  %2479 = vmatprep.subr.bf16.mxu1 %v3629_v12  ;;  %v3658_v31 = vld [vmem:[#allocation5 + $0x730] ss:$40 sps:$4 sm:$0xff]   ;;  %v3661_v33 = vld [vmem:[#allocation5 + $0x784] ss:$40 sps:$4 sm:$0xff]   ;;  %v3663_v34 = vld [vmem:[#allocation5 + $0x280] ss:$40 sps:$4 sm:$0xff]  }
  0x33   :  { %2522 = vmatprep.subr.bf16.mxu0 %v3631_v13  ;;  %v3664_v35 = vld [vmem:[#allocation5 + $0x780] ss:$40 sps:$4 sm:$0xff]   ;;  %v3665_v36 = vld [vmem:[#allocation5 + $0x2d4] ss:$40 sps:$4 sm:$0xff]   ;;  %v3669_v38 = vld [vmem:[#allocation5 + $0x2d0] ss:$40 sps:$4 sm:$0xff]  }
  0x34   :  { %v3667_v37 = vld [vmem:[#allocation5 + $0x7d4] ss:$40 sps:$4 sm:$0xff]   ;;  %v3670_v39 = vld [vmem:[#allocation5 + $0x7d0] ss:$40 sps:$4 sm:$0xff]   ;;  %v3671_v40 = vld [vmem:[#allocation5 + $0x324] ss:$40 sps:$4 sm:$0xff]  }
  0x35   :  { %2480 = vmatpush1.bf16.msra.mxu1 %v3633_v14  ;;  %v3673_v41 = vld [vmem:[#allocation5 + $0x824] ss:$40 sps:$4 sm:$0xff]   ;;  %v3675_v42 = vld [vmem:[#allocation5 + $0x320] ss:$40 sps:$4 sm:$0xff]   ;;  %v3677_v44 = vld [vmem:[#allocation5 + $0x374] ss:$40 sps:$4 sm:$0xff]  }
  0x36   :  { %2523 = vmatpush1.bf16.msra.mxu0 %v3634_v15  ;;  %2481 = vmatprep.subr.bf16.mxu1 %v3635_v16  ;;  %v3676_v43 = vld [vmem:[#allocation5 + $0x820] ss:$40 sps:$4 sm:$0xff]   ;;  %v3679_v45 = vld [vmem:[#allocation5 + $0x874] ss:$40 sps:$4 sm:$0xff]   ;;  %v3681_v46 = vld [vmem:[#allocation5 + $0x370] ss:$40 sps:$4 sm:$0xff]  }
  0x37   :  { %2524 = vmatprep.subr.bf16.mxu0 %v3637_v17  ;;  %v3682_v47 = vld [vmem:[#allocation5 + $0x870] ss:$40 sps:$4 sm:$0xff]   ;;  %v3683_v50 = vld [vmem:[#allocation5 + $0x3c4] ss:$40 sps:$4 sm:$0xff]   ;;  %v3687_v52 = vld [vmem:[#allocation5 + $0x3c0] ss:$40 sps:$4 sm:$0xff]  }
  0x38   :  { %v4344_v48 = vld [vmem:[#allocation2 + $0x4] ss:$20 sps:$4 sm:$0xff]   ;;  %v4346_v49 = vld [vmem:[#allocation2 + $0xc] ss:$20 sps:$4 sm:$0xff]   ;;  %v3688_v53 = vld [vmem:[#allocation5 + $0x8c0] ss:$40 sps:$4 sm:$0xff]  }
  0x39   :  { %2482 = vmatpush1.bf16.msra.mxu1 %v3639_v18  ;;  %v3685_v51 = vld [vmem:[#allocation5 + $0x8c4] ss:$40 sps:$4 sm:$0xff]   ;;  %2505 = vmatprep.mubr.bf16.mxu1 %v4344_v48  ;;  %v3689_v54 = vld [vmem:[#allocation5 + $0x414] ss:$40 sps:$4 sm:$0xff]   ;;  %v3693_v56 = vld [vmem:[#allocation5 + $0x410] ss:$40 sps:$4 sm:$0xff]  }
  0x3a   :  { %2525 = vmatpush1.bf16.msra.mxu0 %v3640_v19  ;;  %2483 = vmatprep.subr.bf16.mxu1 %v3641_v20  ;;  %v3691_v55 = vld [vmem:[#allocation5 + $0x914] ss:$40 sps:$4 sm:$0xff]   ;;  %v3694_v57 = vld [vmem:[#allocation5 + $0x910] ss:$40 sps:$4 sm:$0xff]   ;;  %v3695_v58 = vld [vmem:[#allocation5 + $0x464] ss:$40 sps:$4 sm:$0xff]  }
  0x3b   :  { %2526 = vmatprep.subr.bf16.mxu0 %v3643_v21  ;;  %2548 = vmatprep.mubr.bf16.mxu0 %v4346_v49  ;;  %v3697_v59 = vld [vmem:[#allocation5 + $0x964] ss:$40 sps:$4 sm:$0xff]   ;;  %v3699_v60 = vld [vmem:[#allocation5 + $0x460] ss:$40 sps:$4 sm:$0xff]   ;;  %v3701_v62 = vld [vmem:[#allocation5 + $0x4b4] ss:$40 sps:$4 sm:$0xff]  }
  0x3c   :  { %v3700_v61 = vld [vmem:[#allocation5 + $0x960] ss:$40 sps:$4 sm:$0xff]   ;;  %v3703_v63 = vld [vmem:[#allocation5 + $0x9b4] ss:$40 sps:$4 sm:$0xff]   ;;  %v3705_v0 = vld [vmem:[#allocation5 + $0x4b0] ss:$40 sps:$4 sm:$0xff]  }
  0x3d   :  { %2484 = vmatpush1.bf16.msra.mxu1 %v3645_v22  ;;  %v3706_v1 = vld [vmem:[#allocation5 + $0x9b0] ss:$40 sps:$4 sm:$0xff]   ;;  %v3713_v2 = vld [vmem:[#allocation5 + $0xa04] ss:$40 sps:$4 sm:$0xff]   ;;  %v3711_v4 = vld [vmem:[#allocation5 + $0xa00] ss:$40 sps:$4 sm:$0xff]  }
  0x3e   :  { %2527 = vmatpush1.bf16.msra.mxu0 %v3646_v23  ;;  %2485 = vmatprep.subr.bf16.mxu1 %v3647_v24  ;;  %v3716_v3 = vld [vmem:[#allocation5 + $0xc] ss:$40 sps:$4 sm:$0xff]   ;;  %v3714_v5 = vld [vmem:[#allocation5 + $0x8] ss:$40 sps:$4 sm:$0xff]   ;;  %v3724_v9 = vld [vmem:[#allocation5 + $0x5c] ss:$40 sps:$4 sm:$0xff]  }
  0x3f   :  { %2528 = vmatprep.subr.bf16.mxu0 %v3649_v25  ;;  %v4350_v6 = vld [vmem:[#allocation2] ss:$20 sps:$4 sm:$0xff]   ;;  %v4352_v7 = vld [vmem:[#allocation2 + $0x8] ss:$20 sps:$4 sm:$0xff]   ;;  %v4301_v14 = vmov 0   ;;  %s4302_s1 = smov [#allocation7]  }
  0x40   :  { %v3721_v8 = vld [vmem:[#allocation5 + $0xa54] ss:$40 sps:$4 sm:$0xff]   ;;  %v3719_v10 = vld [vmem:[#allocation5 + $0xa50] ss:$40 sps:$4 sm:$0xff]   ;;  %v3727_v12 = vld [vmem:[#allocation5 + $0xaa4] ss:$40 sps:$4 sm:$0xff]  }
  0x41   :  { %2486 = vmatpush1.bf16.msra.mxu1 %v3651_v26  ;;  %v3722_v11 = vld [vmem:[#allocation5 + $0x58] ss:$40 sps:$4 sm:$0xff]   ;;  %v3730_v13 = vld [vmem:[#allocation5 + $0xac] ss:$40 sps:$4 sm:$0xff]   ;;  %v3728_v16 = vld [vmem:[#allocation5 + $0xa8] ss:$40 sps:$4 sm:$0xff]  }
  0x42   :  { %2529 = vmatpush1.bf16.msra.mxu0 %v3652_v27  ;;  %2487 = vmatprep.subr.bf16.mxu1 %v3653_v28  ;;  %v3725_v15 = vld [vmem:[#allocation5 + $0xaa0] ss:$40 sps:$4 sm:$0xff]   ;;  %v3733_v17 = vld [vmem:[#allocation5 + $0xaf4] ss:$40 sps:$4 sm:$0xff]   ;;  %v3731_v19 = vld [vmem:[#allocation5 + $0xaf0] ss:$40 sps:$4 sm:$0xff]  }
  0x43   :  { %2530 = vmatprep.subr.bf16.mxu0 %v3655_v29  ;;  %v3736_v18 = vld [vmem:[#allocation5 + $0xfc] ss:$40 sps:$4 sm:$0xff]   ;;  %v3734_v20 = vld [vmem:[#allocation5 + $0xf8] ss:$40 sps:$4 sm:$0xff]   ;;  %v3742_v22 = vld [vmem:[#allocation5 + $0x14c] ss:$40 sps:$4 sm:$0xff]  }
  0x44   :  { %v3739_v21 = vld [vmem:[#allocation5 + $0xb44] ss:$40 sps:$4 sm:$0xff]   ;;  %v3737_v23 = vld [vmem:[#allocation5 + $0xb40] ss:$40 sps:$4 sm:$0xff]   ;;  %v3745_v25 = vld [vmem:[#allocation5 + $0xb94] ss:$40 sps:$4 sm:$0xff]  }
  0x45   :  { %2488 = vmatpush1.bf16.msra.mxu1 %v3657_v30  ;;  %v3740_v24 = vld [vmem:[#allocation5 + $0x148] ss:$40 sps:$4 sm:$0xff]   ;;  %v3748_v26 = vld [vmem:[#allocation5 + $0x19c] ss:$40 sps:$4 sm:$0xff]   ;;  %v3746_v28 = vld [vmem:[#allocation5 + $0x198] ss:$40 sps:$4 sm:$0xff]  }
  0x46   :  { %2531 = vmatpush1.bf16.msra.mxu0 %v3658_v31  ;;  %2489 = vmatprep.subr.bf16.mxu1 %v3659_v32  ;;  %v3743_v27 = vld [vmem:[#allocation5 + $0xb90] ss:$40 sps:$4 sm:$0xff]   ;;  %v3751_v29 = vld [vmem:[#allocation5 + $0xbe4] ss:$40 sps:$4 sm:$0xff]   ;;  %v3749_v31 = vld [vmem:[#allocation5 + $0xbe0] ss:$40 sps:$4 sm:$0xff]  }
  0x47   :  { %2532 = vmatprep.subr.bf16.mxu0 %v3661_v33  ;;  %v3754_v30 = vld [vmem:[#allocation5 + $0x1ec] ss:$40 sps:$4 sm:$0xff]   ;;  %v3752_v32 = vld [vmem:[#allocation5 + $0x1e8] ss:$40 sps:$4 sm:$0xff]   ;;  %s3143_s8 = sshll.u32 %s4302_s1, 4  ;;  %s3144_s8 = int_to_ptr.vmem [resolvable:$true] %s3143_s8 }
  0x48   :  { %v3757_v33 = vld [vmem:[#allocation5 + $0xc34] ss:$40 sps:$4 sm:$0xff]   ;;  %s4267_s9 = scalar_lea.vmem %s3144_s8, 2560  ;;  %p4272_p3 = scmp.lt.s32.totalorder %s3144_s8, %s3144_s8 }
  0x49   :  { %2490 = vmatpush1.bf16.msra.mxu1 %v3663_v34  ;;  %v3760_v34 = vld [vmem:[#allocation5 + $0x23c] ss:$40 sps:$4 sm:$0xff]   ;;  %p4268_p2 = scmp.ne.s32.totalorder %s3144_s8, %s4267_s9  ;;  %p4273_p4 = scmp.lt.s32.totalorder %s4267_s9, %s4267_s9 }
  0x4a   :  { %2533 = vmatpush1.bf16.msra.mxu0 %v3664_v35  ;;  %2491 = vmatprep.subr.bf16.mxu1 %v3665_v36  ;;  %v3755_v35 = vld [vmem:[#allocation5 + $0xc30] ss:$40 sps:$4 sm:$0xff]  }
  0x4b   :  { %2534 = vmatprep.subr.bf16.mxu0 %v3667_v37  ;;  %v3758_v36 = vld [vmem:[#allocation5 + $0x238] ss:$40 sps:$4 sm:$0xff]   ;;  %v3764_v37 = vld [vmem:[#allocation5 + $0x28c] ss:$40 sps:$4 sm:$0xff]   ;;  %p4274_p5 = por %p4273_p4, %p4272_p3 }
  0x4d   :  { %2492 = vmatpush1.bf16.msra.mxu1 %v3669_v38  ;;  %v3767_v38 = vld [vmem:[#allocation5 + $0x14] ss:$40 sps:$4 sm:$0xff]   ;;  %p4275_p6 = pnand %p4274_p5, %p4268_p2 }
  0x4e   :  { %2535 = vmatpush1.bf16.msra.mxu0 %v3670_v39  ;;  %2493 = vmatprep.subr.bf16.mxu1 %v3671_v40  ;;  %v4358_v39 = vld [vmem:[#allocation2 + $0x10] ss:$20 sps:$4 sm:$0xff]  }
  0x4f   :  { %2536 = vmatprep.subr.bf16.mxu0 %v3673_v41  ;;  %v3762_v40 = vld [vmem:[#allocation5 + $0x288] ss:$40 sps:$4 sm:$0xff]  }
  0x50   :  { %v3765_v41 = vld [vmem:[#allocation5 + $0x10] ss:$40 sps:$4 sm:$0xff]  }
  0x51   :  { %2494 = vmatpush1.bf16.msra.mxu1 %v3675_v42  ;;  %v3770_v42 = vld [vmem:[#allocation5 + $0x2dc] ss:$40 sps:$4 sm:$0xff]  }
  0x52   :  { %2537 = vmatpush1.bf16.msra.mxu0 %v3676_v43  ;;  %2495 = vmatprep.subr.bf16.mxu1 %v3677_v44  ;;  %v3773_v43 = vld [vmem:[#allocation5 + $0x64] ss:$40 sps:$4 sm:$0xff]   ;;  %v3768_v44 = vld [vmem:[#allocation5 + $0x2d8] ss:$40 sps:$4 sm:$0xff]  }
  0x53   :  { %2538 = vmatprep.subr.bf16.mxu0 %v3679_v45  ;;  %v3771_v45 = vld [vmem:[#allocation5 + $0x60] ss:$40 sps:$4 sm:$0xff]  }
  0x55   :  { %2496 = vmatpush1.bf16.msra.mxu1 %v3681_v46  ;;  %v3776_v46 = vld [vmem:[#allocation5 + $0x32c] ss:$40 sps:$4 sm:$0xff]  }
  0x56   :  { %2539 = vmatpush1.bf16.msra.mxu0 %v3682_v47  ;;  %2497 = vmatprep.subr.bf16.mxu1 %v3683_v50  ;;  %v3779_v47 = vld [vmem:[#allocation5 + $0xb4] ss:$40 sps:$4 sm:$0xff]   ;;  %v3774_v50 = vld [vmem:[#allocation5 + $0x328] ss:$40 sps:$4 sm:$0xff]  }
  0x57   :  { %2540 = vmatprep.subr.bf16.mxu0 %v3685_v51  ;;  %v3777_v51 = vld [vmem:[#allocation5 + $0xb0] ss:$40 sps:$4 sm:$0xff]  }
  0x59   :  { %2498 = vmatpush1.bf16.msra.mxu1 %v3687_v52  ;;  %v3782_v52 = vld [vmem:[#allocation5 + $0x37c] ss:$40 sps:$4 sm:$0xff]  }
  0x5a   :  { %2541 = vmatpush1.bf16.msra.mxu0 %v3688_v53  ;;  %2499 = vmatprep.subr.bf16.mxu1 %v3689_v54  ;;  %v3785_v53 = vld [vmem:[#allocation5 + $0x104] ss:$40 sps:$4 sm:$0xff]   ;;  %v3780_v54 = vld [vmem:[#allocation5 + $0x378] ss:$40 sps:$4 sm:$0xff]  }
  0x5b   :  { %2542 = vmatprep.subr.bf16.mxu0 %v3691_v55  ;;  %v3783_v55 = vld [vmem:[#allocation5 + $0x100] ss:$40 sps:$4 sm:$0xff]  }
  0x5d   :  { %2500 = vmatpush1.bf16.msra.mxu1 %v3693_v56  ;;  %v3788_v56 = vld [vmem:[#allocation5 + $0x3cc] ss:$40 sps:$4 sm:$0xff]  }
  0x5e   :  { %2543 = vmatpush1.bf16.msra.mxu0 %v3694_v57  ;;  %2501 = vmatprep.subr.bf16.mxu1 %v3695_v58  ;;  %v3791_v57 = vld [vmem:[#allocation5 + $0x154] ss:$40 sps:$4 sm:$0xff]   ;;  %v3786_v58 = vld [vmem:[#allocation5 + $0x3c8] ss:$40 sps:$4 sm:$0xff]  }
  0x5f   :  { %2544 = vmatprep.subr.bf16.mxu0 %v3697_v59  ;;  %v3794_v59 = vld [vmem:[#allocation5 + $0x41c] ss:$40 sps:$4 sm:$0xff]  }
  0x61   :  { %2502 = vmatpush1.bf16.msra.mxu1 %v3699_v60  ;;  %v3797_v60 = vld [vmem:[#allocation5 + $0x1a4] ss:$40 sps:$4 sm:$0xff]  }
  0x62   :  { %2545 = vmatpush1.bf16.msra.mxu0 %v3700_v61  ;;  %2503 = vmatprep.subr.bf16.mxu1 %v3701_v62  ;;  %v3792_v61 = vld [vmem:[#allocation5 + $0x418] ss:$40 sps:$4 sm:$0xff]  }
  0x63   :  { %2546 = vmatprep.subr.bf16.mxu0 %v3703_v63  ;;  %v3795_v62 = vld [vmem:[#allocation5 + $0x1a0] ss:$40 sps:$4 sm:$0xff]   ;;  %v3800_v63 = vld [vmem:[#allocation5 + $0x46c] ss:$40 sps:$4 sm:$0xff]  }
  0x65   :  { %2504 = vmatpush1.bf16.msra.mxu1 %v3705_v0  ;;  %v3803_v0 = vld [vmem:[#allocation5 + $0x1f4] ss:$40 sps:$4 sm:$0xff]  }
  0x66   :  { %2547 = vmatpush1.bf16.msra.mxu0 %v3706_v1  ;;  %2602 = vmatprep.subr.bf16.mxu1 %v3716_v3  ;;  %v3798_v1 = vld [vmem:[#allocation5 + $0x468] ss:$40 sps:$4 sm:$0xff]   ;;  %v3806_v3 = vld [vmem:[#allocation5 + $0x4bc] ss:$40 sps:$4 sm:$0xff]  }
  0x67   :  { %2559 = vmatprep.subr.bf16.mxu0 %v3713_v2  ;;  %v3801_v2 = vld [vmem:[#allocation5 + $0x1f0] ss:$40 sps:$4 sm:$0xff]  }
  0x68   :  { %2506 = vmatmul.mubr.bf16.vlgmr.msra.gmra.mrb[0].mxu1 %v4350_v6 }
  0x69   :  { %2549 = vmatmul.mubr.bf16.vlgmr.msra.gmra.mrb[0].mxu0 %v4352_v7  ;;  %2603 = vmatpush1.bf16.msra.mxu1 %v3714_v5  ;;  %v3804_v5 = vld [vmem:[#allocation5 + $0x4b8] ss:$40 sps:$4 sm:$0xff]  }
  0x6a   :  { %2560 = vmatpush1.bf16.msra.mxu0 %v3711_v4  ;;  %2604 = vmatprep.subr.bf16.mxu1 %v3724_v9  ;;  %v3809_v4 = vld [vmem:[#allocation5 + $0x244] ss:$40 sps:$4 sm:$0xff]  }
  0x6b   :  { %2561 = vmatprep.subr.bf16.mxu0 %v3721_v8  ;;  %2591 = vmatprep.mubr.bf16.mxu0 %v4301_v14  ;;  %v3807_v8 = vld [vmem:[#allocation5 + $0x240] ss:$40 sps:$4 sm:$0xff]   ;;  %v3812_v9 = vld [vmem:[#allocation5 + $0x50c] ss:$40 sps:$4 sm:$0xff]  }
  0x6c   :  { %2634 = vmatprep.mubr.bf16.mxu1 %v4344_v48 }
  0x6d   :  { %2605 = vmatpush1.bf16.msra.mxu1 %v3722_v11  ;;  %v3810_v11 = vld [vmem:[#allocation5 + $0x508] ss:$40 sps:$4 sm:$0xff]  }
  0x6e   :  { %2562 = vmatpush1.bf16.msra.mxu0 %v3719_v10  ;;  %2606 = vmatprep.subr.bf16.mxu1 %v3730_v13  ;;  %v3815_v10 = vld [vmem:[#allocation5 + $0x294] ss:$40 sps:$4 sm:$0xff]  }
  0x6f   :  { %2563 = vmatprep.subr.bf16.mxu0 %v3727_v12  ;;  %v3813_v12 = vld [vmem:[#allocation5 + $0x290] ss:$40 sps:$4 sm:$0xff]   ;;  %v3818_v13 = vld [vmem:[#allocation5 + $0x55c] ss:$40 sps:$4 sm:$0xff]  }
  0x71   :  { %2607 = vmatpush1.bf16.msra.mxu1 %v3728_v16  ;;  %v3816_v16 = vld [vmem:[#allocation5 + $0x558] ss:$40 sps:$4 sm:$0xff]  }
  0x72   :  { %2564 = vmatpush1.bf16.msra.mxu0 %v3725_v15  ;;  %2608 = vmatprep.subr.bf16.mxu1 %v3736_v18  ;;  %v3821_v15 = vld [vmem:[#allocation5 + $0x2e4] ss:$40 sps:$4 sm:$0xff]  }
  0x73   :  { %2565 = vmatprep.subr.bf16.mxu0 %v3733_v17  ;;  %v3819_v17 = vld [vmem:[#allocation5 + $0x2e0] ss:$40 sps:$4 sm:$0xff]   ;;  %v3824_v18 = vld [vmem:[#allocation5 + $0x5ac] ss:$40 sps:$4 sm:$0xff]  }
  0x75   :  { %2609 = vmatpush1.bf16.msra.mxu1 %v3734_v20  ;;  %v3822_v20 = vld [vmem:[#allocation5 + $0x5a8] ss:$40 sps:$4 sm:$0xff]  }
  0x76   :  { %2566 = vmatpush1.bf16.msra.mxu0 %v3731_v19  ;;  %2610 = vmatprep.subr.bf16.mxu1 %v3742_v22  ;;  %v3827_v19 = vld [vmem:[#allocation5 + $0x334] ss:$40 sps:$4 sm:$0xff]  }
  0x77   :  { %2567 = vmatprep.subr.bf16.mxu0 %v3739_v21  ;;  %v3825_v21 = vld [vmem:[#allocation5 + $0x330] ss:$40 sps:$4 sm:$0xff]   ;;  %v3830_v22 = vld [vmem:[#allocation5 + $0x5fc] ss:$40 sps:$4 sm:$0xff]  }
  0x79   :  { %2611 = vmatpush1.bf16.msra.mxu1 %v3740_v24  ;;  %v3828_v24 = vld [vmem:[#allocation5 + $0x5f8] ss:$40 sps:$4 sm:$0xff]  }
  0x7a   :  { %2568 = vmatpush1.bf16.msra.mxu0 %v3737_v23  ;;  %2612 = vmatprep.subr.bf16.mxu1 %v3748_v26  ;;  %v3833_v23 = vld [vmem:[#allocation5 + $0x384] ss:$40 sps:$4 sm:$0xff]  }
  0x7b   :  { %2569 = vmatprep.subr.bf16.mxu0 %v3745_v25  ;;  %v3831_v25 = vld [vmem:[#allocation5 + $0x380] ss:$40 sps:$4 sm:$0xff]   ;;  %v3836_v26 = vld [vmem:[#allocation5 + $0x64c] ss:$40 sps:$4 sm:$0xff]  }
  0x7d   :  { %2613 = vmatpush1.bf16.msra.mxu1 %v3746_v28  ;;  %v3834_v28 = vld [vmem:[#allocation5 + $0x648] ss:$40 sps:$4 sm:$0xff]  }
  0x7e   :  { %2570 = vmatpush1.bf16.msra.mxu0 %v3743_v27  ;;  %2614 = vmatprep.subr.bf16.mxu1 %v3754_v30  ;;  %v3839_v27 = vld [vmem:[#allocation5 + $0x3d4] ss:$40 sps:$4 sm:$0xff]  }
  0x7f   :  { %2571 = vmatprep.subr.bf16.mxu0 %v3751_v29  ;;  %v3837_v29 = vld [vmem:[#allocation5 + $0x3d0] ss:$40 sps:$4 sm:$0xff]   ;;  %v3842_v30 = vld [vmem:[#allocation5 + $0x69c] ss:$40 sps:$4 sm:$0xff]  }
  0x81   :  { %2615 = vmatpush1.bf16.msra.mxu1 %v3752_v32  ;;  %v3840_v32 = vld [vmem:[#allocation5 + $0x698] ss:$40 sps:$4 sm:$0xff]  }
  0x82   :  { %2572 = vmatpush1.bf16.msra.mxu0 %v3749_v31  ;;  %2616 = vmatprep.subr.bf16.mxu1 %v3760_v34  ;;  %v3845_v31 = vld [vmem:[#allocation5 + $0x424] ss:$40 sps:$4 sm:$0xff]  }
  0x83   :  { %2573 = vmatprep.subr.bf16.mxu0 %v3757_v33  ;;  %v3843_v33 = vld [vmem:[#allocation5 + $0x420] ss:$40 sps:$4 sm:$0xff]   ;;  %v3848_v34 = vld [vmem:[#allocation5 + $0x6ec] ss:$40 sps:$4 sm:$0xff]  }
  0x85   :  { %2617 = vmatpush1.bf16.msra.mxu1 %v3758_v36  ;;  %v3846_v36 = vld [vmem:[#allocation5 + $0x6e8] ss:$40 sps:$4 sm:$0xff]  }
  0x86   :  { %2574 = vmatpush1.bf16.msra.mxu0 %v3755_v35  ;;  %2618 = vmatprep.subr.bf16.mxu1 %v3764_v37  ;;  %v3851_v35 = vld [vmem:[#allocation5 + $0x474] ss:$40 sps:$4 sm:$0xff]   ;;  %v3849_v37 = vld [vmem:[#allocation5 + $0x470] ss:$40 sps:$4 sm:$0xff]  }
  0x87   :  { %2731 = vmatprep.subr.bf16.mxu0 %v3767_v38  ;;  %v3854_v38 = vld [vmem:[#allocation5 + $0x73c] ss:$40 sps:$4 sm:$0xff]  }
  0x89   :  { %2592 = vmatmul.mubr.bf16.vlgmr.msra.gmra.mrb[0].mxu0 %v4358_v39  ;;  %2619 = vmatpush1.bf16.msra.mxu1 %v3762_v40  ;;  %v3857_v40 = vld [vmem:[#allocation5 + $0x4c4] ss:$40 sps:$4 sm:$0xff]  }
  0x8a   :  { %2732 = vmatpush1.bf16.msra.mxu0 %v3765_v41  ;;  %2620 = vmatprep.subr.bf16.mxu1 %v3770_v42  ;;  %v3852_v41 = vld [vmem:[#allocation5 + $0x738] ss:$40 sps:$4 sm:$0xff]  }
  0x8b   :  { %2733 = vmatprep.subr.bf16.mxu0 %v3773_v43  ;;  %2763 = vmatprep.mubr.bf16.mxu0 %v4344_v48  ;;  %v3789_v48 = vld [vmem:[#allocation5 + $0x150] ss:$40 sps:$4 sm:$0xff]   ;;  %v3855_v42 = vld [vmem:[#allocation5 + $0x4c0] ss:$40 sps:$4 sm:$0xff]   ;;  %v3860_v43 = vld [vmem:[#allocation5 + $0x78c] ss:$40 sps:$4 sm:$0xff]  }
  0x8d   :  { %2621 = vmatpush1.bf16.msra.mxu1 %v3768_v44  ;;  %v3863_v44 = vld [vmem:[#allocation5 + $0x514] ss:$40 sps:$4 sm:$0xff]  }
  0x8e   :  { %2734 = vmatpush1.bf16.msra.mxu0 %v3771_v45  ;;  %2622 = vmatprep.subr.bf16.mxu1 %v3776_v46  ;;  %v3858_v45 = vld [vmem:[#allocation5 + $0x788] ss:$40 sps:$4 sm:$0xff]  }
  0x8f   :  { %2735 = vmatprep.subr.bf16.mxu0 %v3779_v47  ;;  %v3861_v46 = vld [vmem:[#allocation5 + $0x510] ss:$40 sps:$4 sm:$0xff]   ;;  %v3866_v47 = vld [vmem:[#allocation5 + $0x7dc] ss:$40 sps:$4 sm:$0xff]  }
  0x91   :  { %2623 = vmatpush1.bf16.msra.mxu1 %v3774_v50  ;;  %v3869_v50 = vld [vmem:[#allocation5 + $0x564] ss:$40 sps:$4 sm:$0xff]  }
  0x92   :  { %2736 = vmatpush1.bf16.msra.mxu0 %v3777_v51  ;;  %2624 = vmatprep.subr.bf16.mxu1 %v3782_v52  ;;  %v3864_v51 = vld [vmem:[#allocation5 + $0x7d8] ss:$40 sps:$4 sm:$0xff]  }
  0x93   :  { %2737 = vmatprep.subr.bf16.mxu0 %v3785_v53  ;;  %v3867_v52 = vld [vmem:[#allocation5 + $0x560] ss:$40 sps:$4 sm:$0xff]   ;;  %v3872_v53 = vld [vmem:[#allocation5 + $0x82c] ss:$40 sps:$4 sm:$0xff]  }
  0x95   :  { %2625 = vmatpush1.bf16.msra.mxu1 %v3780_v54  ;;  %v3875_v54 = vld [vmem:[#allocation5 + $0x5b4] ss:$40 sps:$4 sm:$0xff]  }
  0x96   :  { %2738 = vmatpush1.bf16.msra.mxu0 %v3783_v55  ;;  %2626 = vmatprep.subr.bf16.mxu1 %v3788_v56  ;;  %v3870_v55 = vld [vmem:[#allocation5 + $0x828] ss:$40 sps:$4 sm:$0xff]  }
  0x97   :  { %2739 = vmatprep.subr.bf16.mxu0 %v3791_v57  ;;  %v3873_v56 = vld [vmem:[#allocation5 + $0x5b0] ss:$40 sps:$4 sm:$0xff]   ;;  %v3878_v57 = vld [vmem:[#allocation5 + $0x87c] ss:$40 sps:$4 sm:$0xff]  }
  0x99   :  { %2627 = vmatpush1.bf16.msra.mxu1 %v3786_v58  ;;  %v3881_v58 = vld [vmem:[#allocation5 + $0x604] ss:$40 sps:$4 sm:$0xff]  }
  0x9a   :  { %2740 = vmatpush1.bf16.msra.mxu0 %v3789_v48  ;;  %2628 = vmatprep.subr.bf16.mxu1 %v3794_v59  ;;  %v3876_v48 = vld [vmem:[#allocation5 + $0x878] ss:$40 sps:$4 sm:$0xff]   ;;  %v3884_v59 = vld [vmem:[#allocation5 + $0x8cc] ss:$40 sps:$4 sm:$0xff]  }
  0x9b   :  { %2741 = vmatprep.subr.bf16.mxu0 %v3797_v60  ;;  %v3887_v60 = vld [vmem:[#allocation5 + $0x654] ss:$40 sps:$4 sm:$0xff]  }
  0x9d   :  { %2629 = vmatpush1.bf16.msra.mxu1 %v3792_v61  ;;  %v3882_v61 = vld [vmem:[#allocation5 + $0x8c8] ss:$40 sps:$4 sm:$0xff]  }
  0x9e   :  { %2742 = vmatpush1.bf16.msra.mxu0 %v3795_v62  ;;  %2630 = vmatprep.subr.bf16.mxu1 %v3800_v63  ;;  %v3890_v62 = vld [vmem:[#allocation5 + $0x91c] ss:$40 sps:$4 sm:$0xff]  }
  0x9f   :  { %2743 = vmatprep.subr.bf16.mxu0 %v3803_v0  ;;  %v3893_v63 = vld [vmem:[#allocation5 + $0x6a4] ss:$40 sps:$4 sm:$0xff]   ;;  %v3888_v0 = vld [vmem:[#allocation5 + $0x918] ss:$40 sps:$4 sm:$0xff]  }
  0xa1   :  { %2631 = vmatpush1.bf16.msra.mxu1 %v3798_v1  ;;  %v3891_v1 = vld [vmem:[#allocation5 + $0x6a0] ss:$40 sps:$4 sm:$0xff]  }
  0xa2   :  { %2744 = vmatpush1.bf16.msra.mxu0 %v3801_v2  ;;  %2632 = vmatprep.subr.bf16.mxu1 %v3806_v3  ;;  %v3896_v2 = vld [vmem:[#allocation5 + $0x96c] ss:$40 sps:$4 sm:$0xff]  }
  0xa3   :  { %2745 = vmatprep.subr.bf16.mxu0 %v3809_v4  ;;  %v3899_v3 = vld [vmem:[#allocation5 + $0x6f4] ss:$40 sps:$4 sm:$0xff]   ;;  %v3894_v4 = vld [vmem:[#allocation5 + $0x968] ss:$40 sps:$4 sm:$0xff]  }
  0xa5   :  { %2633 = vmatpush1.bf16.msra.mxu1 %v3804_v5  ;;  %v3897_v5 = vld [vmem:[#allocation5 + $0x6f0] ss:$40 sps:$4 sm:$0xff]  }
  0xa6   :  { %2746 = vmatpush1.bf16.msra.mxu0 %v3807_v8  ;;  %2645 = vmatprep.subr.bf16.mxu1 %v3812_v9  ;;  %v3902_v8 = vld [vmem:[#allocation5 + $0x9bc] ss:$40 sps:$4 sm:$0xff]  }
  0xa7   :  { %2747 = vmatprep.subr.bf16.mxu0 %v3815_v10  ;;  %v3905_v9 = vld [vmem:[#allocation5 + $0x744] ss:$40 sps:$4 sm:$0xff]   ;;  %v3900_v10 = vld [vmem:[#allocation5 + $0x9b8] ss:$40 sps:$4 sm:$0xff]  }
  0xa8   :  { %2635 = vmatmul.mubr.bf16.vlgmr.msra.gmra.mrb[4].mxu1 %v4350_v6 }
  0xa9   :  { %2646 = vmatpush1.bf16.msra.mxu1 %v3810_v11  ;;  %2677 = vmatprep.mubr.bf16.mxu1 %v4346_v49  ;;  %v3903_v11 = vld [vmem:[#allocation5 + $0x740] ss:$40 sps:$4 sm:$0xff]  }
  0xaa   :  { %2748 = vmatpush1.bf16.msra.mxu0 %v3813_v12  ;;  %2647 = vmatprep.subr.bf16.mxu1 %v3818_v13  ;;  %v3908_v12 = vld [vmem:[#allocation5 + $0xa0c] ss:$40 sps:$4 sm:$0xff]  }
  0xab   :  { %2749 = vmatprep.subr.bf16.mxu0 %v3821_v15  ;;  %v3911_v13 = vld [vmem:[#allocation5 + $0x794] ss:$40 sps:$4 sm:$0xff]   ;;  %v3906_v15 = vld [vmem:[#allocation5 + $0xa08] ss:$40 sps:$4 sm:$0xff]  }
  0xad   :  { %2648 = vmatpush1.bf16.msra.mxu1 %v3816_v16  ;;  %v3909_v16 = vld [vmem:[#allocation5 + $0x790] ss:$40 sps:$4 sm:$0xff]  }
  0xae   :  { %2750 = vmatpush1.bf16.msra.mxu0 %v3819_v17  ;;  %2649 = vmatprep.subr.bf16.mxu1 %v3824_v18  ;;  %v3914_v17 = vld [vmem:[#allocation5 + $0xa5c] ss:$40 sps:$4 sm:$0xff]  }
  0xaf   :  { %2751 = vmatprep.subr.bf16.mxu0 %v3827_v19  ;;  %v3917_v18 = vld [vmem:[#allocation5 + $0x7e4] ss:$40 sps:$4 sm:$0xff]   ;;  %v3912_v19 = vld [vmem:[#allocation5 + $0xa58] ss:$40 sps:$4 sm:$0xff]  }
  0xb1   :  { %2650 = vmatpush1.bf16.msra.mxu1 %v3822_v20  ;;  %v3915_v20 = vld [vmem:[#allocation5 + $0x7e0] ss:$40 sps:$4 sm:$0xff]  }
  0xb2   :  { %2752 = vmatpush1.bf16.msra.mxu0 %v3825_v21  ;;  %2651 = vmatprep.subr.bf16.mxu1 %v3830_v22  ;;  %v3920_v21 = vld [vmem:[#allocation5 + $0xaac] ss:$40 sps:$4 sm:$0xff]  }
  0xb3   :  { %2753 = vmatprep.subr.bf16.mxu0 %v3833_v23  ;;  %v3923_v22 = vld [vmem:[#allocation5 + $0x834] ss:$40 sps:$4 sm:$0xff]   ;;  %v3918_v23 = vld [vmem:[#allocation5 + $0xaa8] ss:$40 sps:$4 sm:$0xff]  }
  0xb5   :  { %2652 = vmatpush1.bf16.msra.mxu1 %v3828_v24  ;;  %v3921_v24 = vld [vmem:[#allocation5 + $0x830] ss:$40 sps:$4 sm:$0xff]  }
  0xb6   :  { %2754 = vmatpush1.bf16.msra.mxu0 %v3831_v25  ;;  %2653 = vmatprep.subr.bf16.mxu1 %v3836_v26  ;;  %v3926_v25 = vld [vmem:[#allocation5 + $0xafc] ss:$40 sps:$4 sm:$0xff]  }
  0xb7   :  { %2755 = vmatprep.subr.bf16.mxu0 %v3839_v27  ;;  %v3929_v26 = vld [vmem:[#allocation5 + $0x884] ss:$40 sps:$4 sm:$0xff]   ;;  %v3924_v27 = vld [vmem:[#allocation5 + $0xaf8] ss:$40 sps:$4 sm:$0xff]  }
  0xb9   :  { %2654 = vmatpush1.bf16.msra.mxu1 %v3834_v28  ;;  %v3932_v28 = vld [vmem:[#allocation5 + $0xb4c] ss:$40 sps:$4 sm:$0xff]  }
  0xba   :  { %2756 = vmatpush1.bf16.msra.mxu0 %v3837_v29  ;;  %2655 = vmatprep.subr.bf16.mxu1 %v3842_v30  ;;  %v3935_v29 = vld [vmem:[#allocation5 + $0x8d4] ss:$40 sps:$4 sm:$0xff]   ;;  %v3930_v30 = vld [vmem:[#allocation5 + $0xb48] ss:$40 sps:$4 sm:$0xff]  }
  0xbb   :  { %2757 = vmatprep.subr.bf16.mxu0 %v3845_v31  ;;  %v3933_v31 = vld [vmem:[#allocation5 + $0x8d0] ss:$40 sps:$4 sm:$0xff]  }
  0xbd   :  { %2656 = vmatpush1.bf16.msra.mxu1 %v3840_v32  ;;  %v3938_v32 = vld [vmem:[#allocation5 + $0xb9c] ss:$40 sps:$4 sm:$0xff]  }
  0xbe   :  { %2758 = vmatpush1.bf16.msra.mxu0 %v3843_v33  ;;  %2657 = vmatprep.subr.bf16.mxu1 %v3848_v34  ;;  %v3941_v33 = vld [vmem:[#allocation5 + $0x924] ss:$40 sps:$4 sm:$0xff]   ;;  %v3936_v34 = vld [vmem:[#allocation5 + $0xb98] ss:$40 sps:$4 sm:$0xff]  }
  0xbf   :  { %2759 = vmatprep.subr.bf16.mxu0 %v3851_v35  ;;  %v3939_v35 = vld [vmem:[#allocation5 + $0x920] ss:$40 sps:$4 sm:$0xff]  }
  0xc1   :  { %2658 = vmatpush1.bf16.msra.mxu1 %v3846_v36  ;;  %v3944_v36 = vld [vmem:[#allocation5 + $0xbec] ss:$40 sps:$4 sm:$0xff]  }
  0xc2   :  { %2760 = vmatpush1.bf16.msra.mxu0 %v3849_v37  ;;  %2659 = vmatprep.subr.bf16.mxu1 %v3854_v38  ;;  %v3947_v37 = vld [vmem:[#allocation5 + $0x974] ss:$40 sps:$4 sm:$0xff]   ;;  %v3942_v38 = vld [vmem:[#allocation5 + $0xbe8] ss:$40 sps:$4 sm:$0xff]  }
  0xc3   :  { %2761 = vmatprep.subr.bf16.mxu0 %v3857_v40  ;;  %v3945_v40 = vld [vmem:[#allocation5 + $0x970] ss:$40 sps:$4 sm:$0xff]  }
  0xc5   :  { %2660 = vmatpush1.bf16.msra.mxu1 %v3852_v41  ;;  %v3950_v41 = vld [vmem:[#allocation5 + $0xc3c] ss:$40 sps:$4 sm:$0xff]  }
  0xc6   :  { %2762 = vmatpush1.bf16.msra.mxu0 %v3855_v42  ;;  %2661 = vmatprep.subr.bf16.mxu1 %v3860_v43  ;;  %v3953_v42 = vld [vmem:[#allocation5 + $0x9c4] ss:$40 sps:$4 sm:$0xff]   ;;  %v3948_v43 = vld [vmem:[#allocation5 + $0xc38] ss:$40 sps:$4 sm:$0xff]  }
  0xc7   :  { %2774 = vmatprep.subr.bf16.mxu0 %v3863_v44  ;;  %v3951_v44 = vld [vmem:[#allocation5 + $0x9c0] ss:$40 sps:$4 sm:$0xff]  }
  0xc9   :  { %2764 = vmatmul.mubr.bf16.vlgmr.msra.gmra.mrb[4].mxu0 %v4350_v6  ;;  %2662 = vmatpush1.bf16.msra.mxu1 %v3858_v45  ;;  %v3879_v6 = vld [vmem:[#allocation5 + $0x600] ss:$40 sps:$4 sm:$0xff]   ;;  %v3956_v45 = vld [vmem:[#allocation5 + $0xa14] ss:$40 sps:$4 sm:$0xff]  }
  0xca   :  { %2775 = vmatpush1.bf16.msra.mxu0 %v3861_v46  ;;  %2663 = vmatprep.subr.bf16.mxu1 %v3866_v47  ;;  %v3959_v46 = vld [vmem:[#allocation5 + $0x1c] ss:$40 sps:$4 sm:$0xff]   ;;  %v3954_v47 = vld [vmem:[#allocation5 + $0xa10] ss:$40 sps:$4 sm:$0xff]  }
  0xcb   :  { %2776 = vmatprep.subr.bf16.mxu0 %v3869_v50  ;;  %2806 = vmatprep.mubr.bf16.mxu0 %v4346_v49  ;;  %v3885_v49 = vld [vmem:[#allocation5 + $0x650] ss:$40 sps:$4 sm:$0xff]  }
  0xcc   :  { %v3957_v50 = vld [vmem:[#allocation5 + $0x18] ss:$40 sps:$4 sm:$0xff]  }
  0xcd   :  { %2664 = vmatpush1.bf16.msra.mxu1 %v3864_v51  ;;  %v3962_v51 = vld [vmem:[#allocation5 + $0xa64] ss:$40 sps:$4 sm:$0xff]  }
  0xce   :  { %2777 = vmatpush1.bf16.msra.mxu0 %v3867_v52  ;;  %2665 = vmatprep.subr.bf16.mxu1 %v3872_v53  ;;  %v3965_v52 = vld [vmem:[#allocation5 + $0x6c] ss:$40 sps:$4 sm:$0xff]  }
  0xcf   :  { %2778 = vmatprep.subr.bf16.mxu0 %v3875_v54  ;;  %v4369_v53 = vld [vmem:[#allocation2 + $0x8] ss:$20 sps:$4 sm:$0xff]  }
  0xd0   :  { %v3960_v54 = vld [vmem:[#allocation5 + $0xa60] ss:$40 sps:$4 sm:$0xff]  }
  0xd1   :  { %2666 = vmatpush1.bf16.msra.mxu1 %v3870_v55  ;;  %v3963_v55 = vld [vmem:[#allocation5 + $0x68] ss:$40 sps:$4 sm:$0xff]  }
  0xd2   :  { %2779 = vmatpush1.bf16.msra.mxu0 %v3873_v56  ;;  %2667 = vmatprep.subr.bf16.mxu1 %v3878_v57  ;;  %v3968_v56 = vld [vmem:[#allocation5 + $0xab4] ss:$40 sps:$4 sm:$0xff]  }
  0xd3   :  { %2780 = vmatprep.subr.bf16.mxu0 %v3881_v58  ;;  %v3971_v57 = vld [vmem:[#allocation5 + $0xbc] ss:$40 sps:$4 sm:$0xff]  }
  0xd4   :  { %v4373_v58 = vld [vmem:[#allocation2 + $0x4] ss:$20 sps:$4 sm:$0xff]  }
  0xd5   :  { %2668 = vmatpush1.bf16.msra.mxu1 %v3876_v48  ;;  %v3966_v48 = vld [vmem:[#allocation5 + $0xab0] ss:$40 sps:$4 sm:$0xff]  }
  0xd6   :  { %2781 = vmatpush1.bf16.msra.mxu0 %v3879_v6  ;;  %2669 = vmatprep.subr.bf16.mxu1 %v3884_v59  ;;  %v3974_v6 = vld [vmem:[#allocation5 + $0xb04] ss:$40 sps:$4 sm:$0xff]  }
  0xd7   :  { %2782 = vmatprep.subr.bf16.mxu0 %v3887_v60  ;;  %v3977_v59 = vld [vmem:[#allocation5 + $0x10c] ss:$40 sps:$4 sm:$0xff]   ;;  %v3972_v60 = vld [vmem:[#allocation5 + $0xb00] ss:$40 sps:$4 sm:$0xff]  }
  0xd9   :  { %2670 = vmatpush1.bf16.msra.mxu1 %v3882_v61  ;;  %v3975_v61 = vld [vmem:[#allocation5 + $0x108] ss:$40 sps:$4 sm:$0xff]  }
  0xda   :  { %2783 = vmatpush1.bf16.msra.mxu0 %v3885_v49  ;;  %2671 = vmatprep.subr.bf16.mxu1 %v3890_v62  ;;  %v3980_v49 = vld [vmem:[#allocation5 + $0xb54] ss:$40 sps:$4 sm:$0xff]  }
  0xdb   :  { %2784 = vmatprep.subr.bf16.mxu0 %v3893_v63  ;;  %v3983_v62 = vld [vmem:[#allocation5 + $0x15c] ss:$40 sps:$4 sm:$0xff]   ;;  %v3978_v63 = vld [vmem:[#allocation5 + $0xb50] ss:$40 sps:$4 sm:$0xff]  }
  0xdd   :  { %2672 = vmatpush1.bf16.msra.mxu1 %v3888_v0  ;;  %v3981_v0 = vld [vmem:[#allocation5 + $0x158] ss:$40 sps:$4 sm:$0xff]  }
  0xde   :  { %2785 = vmatpush1.bf16.msra.mxu0 %v3891_v1  ;;  %2673 = vmatprep.subr.bf16.mxu1 %v3896_v2  ;;  %v3986_v1 = vld [vmem:[#allocation5 + $0xba4] ss:$40 sps:$4 sm:$0xff]  }
  0xdf   :  { %2786 = vmatprep.subr.bf16.mxu0 %v3899_v3  ;;  %v3989_v2 = vld [vmem:[#allocation5 + $0x1ac] ss:$40 sps:$4 sm:$0xff]   ;;  %v3984_v3 = vld [vmem:[#allocation5 + $0xba0] ss:$40 sps:$4 sm:$0xff]  }
  0xe1   :  { %2674 = vmatpush1.bf16.msra.mxu1 %v3894_v4  ;;  %v3987_v4 = vld [vmem:[#allocation5 + $0x1a8] ss:$40 sps:$4 sm:$0xff]  }
  0xe2   :  { %2787 = vmatpush1.bf16.msra.mxu0 %v3897_v5  ;;  %2675 = vmatprep.subr.bf16.mxu1 %v3902_v8  ;;  %v3992_v5 = vld [vmem:[#allocation5 + $0xbf4] ss:$40 sps:$4 sm:$0xff]  }
  0xe3   :  { %2788 = vmatprep.subr.bf16.mxu0 %v3905_v9  ;;  %v3995_v8 = vld [vmem:[#allocation5 + $0x1fc] ss:$40 sps:$4 sm:$0xff]   ;;  %v3990_v9 = vld [vmem:[#allocation5 + $0xbf0] ss:$40 sps:$4 sm:$0xff]  }
  0xe5   :  { %2676 = vmatpush1.bf16.msra.mxu1 %v3900_v10  ;;  %v3993_v10 = vld [vmem:[#allocation5 + $0x1f8] ss:$40 sps:$4 sm:$0xff]  }
  0xe6   :  { %2789 = vmatpush1.bf16.msra.mxu0 %v3903_v11  ;;  %2688 = vmatprep.subr.bf16.mxu1 %v3908_v12  ;;  %v3998_v11 = vld [vmem:[#allocation5 + $0xc44] ss:$40 sps:$4 sm:$0xff]  }
  0xe7   :  { %2790 = vmatprep.subr.bf16.mxu0 %v3911_v13  ;;  %v4001_v12 = vld [vmem:[#allocation5 + $0x24c] ss:$40 sps:$4 sm:$0xff]   ;;  %v3996_v13 = vld [vmem:[#allocation5 + $0xc40] ss:$40 sps:$4 sm:$0xff]  }
  0xe8   :  { %2678 = vmatmul.mubr.bf16.vlgmr.msra.gmra.mrb[4].mxu1 %v4352_v7  ;;  %v3927_v7 = vld [vmem:[#allocation5 + $0x880] ss:$40 sps:$4 sm:$0xff]  }
  0xe9   :  { %2689 = vmatpush1.bf16.msra.mxu1 %v3906_v15  ;;  %2720 = vmatprep.mubr.bf16.mxu1 %v4301_v14  ;;  %v3999_v15 = vld [vmem:[#allocation5 + $0x248] ss:$40 sps:$4 sm:$0xff]  }
  0xea   :  { %2791 = vmatpush1.bf16.msra.mxu0 %v3909_v16  ;;  %2690 = vmatprep.subr.bf16.mxu1 %v3914_v17  ;;  %v4004_v16 = vld [vmem:[#allocation5 + $0x29c] ss:$40 sps:$4 sm:$0xff]  }
  0xeb   :  { %2792 = vmatprep.subr.bf16.mxu0 %v3917_v18  ;;  %v4007_v17 = vld [vmem:[#allocation5 + $0x24] ss:$40 sps:$4 sm:$0xff]   ;;  %v4002_v18 = vld [vmem:[#allocation5 + $0x298] ss:$40 sps:$4 sm:$0xff]  }
  0xed   :  { %2691 = vmatpush1.bf16.msra.mxu1 %v3912_v19  ;;  %v4005_v19 = vld [vmem:[#allocation5 + $0x20] ss:$40 sps:$4 sm:$0xff]  }
  0xee   :  { %2793 = vmatpush1.bf16.msra.mxu0 %v3915_v20  ;;  %2692 = vmatprep.subr.bf16.mxu1 %v3920_v21  ;;  %v4010_v20 = vld [vmem:[#allocation5 + $0x2ec] ss:$40 sps:$4 sm:$0xff]  }
  0xef   :  { %2794 = vmatprep.subr.bf16.mxu0 %v3923_v22  ;;  %v4013_v21 = vld [vmem:[#allocation5 + $0x74] ss:$40 sps:$4 sm:$0xff]  }
  0xf0   :  { %v4376_v22 = vld [vmem:[#allocation2 + $0x10] ss:$20 sps:$4 sm:$0xff]  }
  0xf1   :  { %2693 = vmatpush1.bf16.msra.mxu1 %v3918_v23  ;;  %v4008_v23 = vld [vmem:[#allocation5 + $0x2e8] ss:$40 sps:$4 sm:$0xff]  }
  0xf2   :  { %2795 = vmatpush1.bf16.msra.mxu0 %v3921_v24  ;;  %2694 = vmatprep.subr.bf16.mxu1 %v3926_v25  ;;  %v4011_v24 = vld [vmem:[#allocation5 + $0x70] ss:$40 sps:$4 sm:$0xff]   ;;  %v4016_v25 = vld [vmem:[#allocation5 + $0x33c] ss:$40 sps:$4 sm:$0xff]  }
  0xf3   :  { %2796 = vmatprep.subr.bf16.mxu0 %v3929_v26  ;;  %v4019_v26 = vld [vmem:[#allocation5 + $0xc4] ss:$40 sps:$4 sm:$0xff]  }
  0xf5   :  { %2695 = vmatpush1.bf16.msra.mxu1 %v3924_v27  ;;  %v4014_v27 = vld [vmem:[#allocation5 + $0x338] ss:$40 sps:$4 sm:$0xff]  }
  0xf6   :  { %2797 = vmatpush1.bf16.msra.mxu0 %v3927_v7  ;;  %2696 = vmatprep.subr.bf16.mxu1 %v3932_v28  ;;  %v4017_v7 = vld [vmem:[#allocation5 + $0xc0] ss:$40 sps:$4 sm:$0xff]   ;;  %v4022_v28 = vld [vmem:[#allocation5 + $0x38c] ss:$40 sps:$4 sm:$0xff]  }
  0xf7   :  { %2798 = vmatprep.subr.bf16.mxu0 %v3935_v29  ;;  %v4025_v29 = vld [vmem:[#allocation5 + $0x114] ss:$40 sps:$4 sm:$0xff]  }
  0xf9   :  { %2697 = vmatpush1.bf16.msra.mxu1 %v3930_v30  ;;  %v4020_v30 = vld [vmem:[#allocation5 + $0x388] ss:$40 sps:$4 sm:$0xff]  }
  0xfa   :  { %2799 = vmatpush1.bf16.msra.mxu0 %v3933_v31  ;;  %2698 = vmatprep.subr.bf16.mxu1 %v3938_v32  ;;  %v4023_v31 = vld [vmem:[#allocation5 + $0x110] ss:$40 sps:$4 sm:$0xff]   ;;  %v4028_v32 = vld [vmem:[#allocation5 + $0x3dc] ss:$40 sps:$4 sm:$0xff]  }
  0xfb   :  { %2800 = vmatprep.subr.bf16.mxu0 %v3941_v33  ;;  %v4031_v33 = vld [vmem:[#allocation5 + $0x164] ss:$40 sps:$4 sm:$0xff]  }
  0xfd   :  { %2699 = vmatpush1.bf16.msra.mxu1 %v3936_v34  ;;  %v4026_v34 = vld [vmem:[#allocation5 + $0x3d8] ss:$40 sps:$4 sm:$0xff]  }
  0xfe   :  { %2801 = vmatpush1.bf16.msra.mxu0 %v3939_v35  ;;  %2700 = vmatprep.subr.bf16.mxu1 %v3944_v36  ;;  %v4029_v35 = vld [vmem:[#allocation5 + $0x160] ss:$40 sps:$4 sm:$0xff]   ;;  %v4034_v36 = vld [vmem:[#allocation5 + $0x42c] ss:$40 sps:$4 sm:$0xff]  }
  0xff   :  { %2802 = vmatprep.subr.bf16.mxu0 %v3947_v37  ;;  %v4037_v37 = vld [vmem:[#allocation5 + $0x1b4] ss:$40 sps:$4 sm:$0xff]  }
 0x101   :  { %2701 = vmatpush1.bf16.msra.mxu1 %v3942_v38  ;;  %v4032_v38 = vld [vmem:[#allocation5 + $0x428] ss:$40 sps:$4 sm:$0xff]  }
 0x102   :  { %2803 = vmatpush1.bf16.msra.mxu0 %v3945_v40  ;;  %2702 = vmatprep.subr.bf16.mxu1 %v3950_v41  ;;  %v4035_v40 = vld [vmem:[#allocation5 + $0x1b0] ss:$40 sps:$4 sm:$0xff]   ;;  %v4040_v41 = vld [vmem:[#allocation5 + $0x47c] ss:$40 sps:$4 sm:$0xff]  }
 0x103   :  { %2804 = vmatprep.subr.bf16.mxu0 %v3953_v42  ;;  %v4043_v42 = vld [vmem:[#allocation5 + $0x204] ss:$40 sps:$4 sm:$0xff]  }
 0x105   :  { %2703 = vmatpush1.bf16.msra.mxu1 %v3948_v43 }
 0x106   :  { %2805 = vmatpush1.bf16.msra.mxu0 %v3951_v44  ;;  %2860 = vmatprep.subr.bf16.mxu1 %v3959_v46  ;;  %v4041_v46 = vld [vmem:[#allocation5 + $0x200] ss:$40 sps:$4 sm:$0xff]  }
 0x107   :  { %2817 = vmatprep.subr.bf16.mxu0 %v3956_v45  ;;  %v4038_v45 = vld [vmem:[#allocation5 + $0x478] ss:$40 sps:$4 sm:$0xff]  }
 0x108   :  { %2721 = vmatmul.mubr.bf16.vlgmr.msra.gmra.mrb[4].mxu1 %v4358_v39  ;;  %v3969_v39 = vld [vmem:[#allocation5 + $0xb8] ss:$40 sps:$4 sm:$0xff]  }
 0x109   :  { %2807 = vmatmul.mubr.bf16.vlgmr.msra.gmra.mrb[4].mxu0 %v4369_v53  ;;  %2861 = vmatpush1.bf16.msra.mxu1 %v3957_v50  ;;  %v4046_v50 = vld [vmem:[#allocation5 + $0x4cc] ss:$40 sps:$4 sm:$0xff]  }
 0x10a   :  { %2818 = vmatpush1.bf16.msra.mxu0 %v3954_v47  ;;  %2862 = vmatprep.subr.bf16.mxu1 %v3965_v52 }
 0x10b   :  { %2819 = vmatprep.subr.bf16.mxu0 %v3962_v51  ;;  %2849 = vmatprep.mubr.bf16.mxu0 %v4301_v14  ;;  %v4049_v51 = vld [vmem:[#allocation5 + $0x254] ss:$40 sps:$4 sm:$0xff]  }
 0x10c   :  { %2892 = vmatprep.mubr.bf16.mxu1 %v4373_v58 }
 0x10d   :  { %2863 = vmatpush1.bf16.msra.mxu1 %v3963_v55  ;;  %v4047_v55 = vld [vmem:[#allocation5 + $0x250] ss:$40 sps:$4 sm:$0xff]  }
 0x10e   :  { %2820 = vmatpush1.bf16.msra.mxu0 %v3960_v54  ;;  %2864 = vmatprep.subr.bf16.mxu1 %v3971_v57  ;;  %v4044_v54 = vld [vmem:[#allocation5 + $0x4c8] ss:$40 sps:$4 sm:$0xff]   ;;  %v4055_v57 = vld [vmem:[#allocation5 + $0x2a4] ss:$40 sps:$4 sm:$0xff]  }
 0x10f   :  { %2821 = vmatprep.subr.bf16.mxu0 %v3968_v56  ;;  %v4052_v56 = vld [vmem:[#allocation5 + $0x51c] ss:$40 sps:$4 sm:$0xff]  }
 0x111   :  { %2865 = vmatpush1.bf16.msra.mxu1 %v3969_v39  ;;  %v4058_v39 = vld [vmem:[#allocation5 + $0x56c] ss:$40 sps:$4 sm:$0xff]  }
 0x112   :  { %2822 = vmatpush1.bf16.msra.mxu0 %v3966_v48  ;;  %2866 = vmatprep.subr.bf16.mxu1 %v3977_v59  ;;  %v4053_v48 = vld [vmem:[#allocation5 + $0x2a0] ss:$40 sps:$4 sm:$0xff]   ;;  %v4388_v59 = vld [vmem:[#allocation2] ss:$20 sps:$4 sm:$0xff]  }
 0x113   :  { %2823 = vmatprep.subr.bf16.mxu0 %v3974_v6  ;;  %v4061_v6 = vld [vmem:[#allocation5 + $0x2f4] ss:$40 sps:$4 sm:$0xff]  }
 0x115   :  { %2867 = vmatpush1.bf16.msra.mxu1 %v3975_v61  ;;  %v4059_v61 = vld [vmem:[#allocation5 + $0x2f0] ss:$40 sps:$4 sm:$0xff]  }
 0x116   :  { %2824 = vmatpush1.bf16.msra.mxu0 %v3972_v60  ;;  %2868 = vmatprep.subr.bf16.mxu1 %v3983_v62  ;;  %v4056_v60 = vld [vmem:[#allocation5 + $0x568] ss:$40 sps:$4 sm:$0xff]   ;;  %v4067_v62 = vld [vmem:[#allocation5 + $0x344] ss:$40 sps:$4 sm:$0xff]  }
 0x117   :  { %2825 = vmatprep.subr.bf16.mxu0 %v3980_v49  ;;  %v4064_v49 = vld [vmem:[#allocation5 + $0x5bc] ss:$40 sps:$4 sm:$0xff]  }
 0x119   :  { %2869 = vmatpush1.bf16.msra.mxu1 %v3981_v0  ;;  %v4062_v0 = vld [vmem:[#allocation5 + $0x5b8] ss:$40 sps:$4 sm:$0xff]  }
 0x11a   :  { %2826 = vmatpush1.bf16.msra.mxu0 %v3978_v63  ;;  %2870 = vmatprep.subr.bf16.mxu1 %v3989_v2  ;;  %v4391_v63 = vld [vmem:[#allocation2 + $0xc] ss:$20 sps:$4 sm:$0xff]   ;;  %v4070_v2 = vld [vmem:[#allocation5 + $0x60c] ss:$40 sps:$4 sm:$0xff]  }
 0x11b   :  { %2827 = vmatprep.subr.bf16.mxu0 %v3986_v1  ;;  %v4065_v1 = vld [vmem:[#allocation5 + $0x340] ss:$40 sps:$4 sm:$0xff]  }
 0x11d   :  { %2871 = vmatpush1.bf16.msra.mxu1 %v3987_v4  ;;  %v4068_v4 = vld [vmem:[#allocation5 + $0x608] ss:$40 sps:$4 sm:$0xff]  }
 0x11e   :  { %2828 = vmatpush1.bf16.msra.mxu0 %v3984_v3  ;;  %2872 = vmatprep.subr.bf16.mxu1 %v3995_v8  ;;  %v4073_v3 = vld [vmem:[#allocation5 + $0x394] ss:$40 sps:$4 sm:$0xff]  }
 0x11f   :  { %2829 = vmatprep.subr.bf16.mxu0 %v3992_v5  ;;  %v4071_v5 = vld [vmem:[#allocation5 + $0x390] ss:$40 sps:$4 sm:$0xff]   ;;  %v4076_v8 = vld [vmem:[#allocation5 + $0x65c] ss:$40 sps:$4 sm:$0xff]  }
 0x121   :  { %2873 = vmatpush1.bf16.msra.mxu1 %v3993_v10  ;;  %v4074_v10 = vld [vmem:[#allocation5 + $0x658] ss:$40 sps:$4 sm:$0xff]  }
 0x122   :  { %2830 = vmatpush1.bf16.msra.mxu0 %v3990_v9  ;;  %2874 = vmatprep.subr.bf16.mxu1 %v4001_v12  ;;  %v4079_v9 = vld [vmem:[#allocation5 + $0x3e4] ss:$40 sps:$4 sm:$0xff]  }
 0x123   :  { %2831 = vmatprep.subr.bf16.mxu0 %v3998_v11  ;;  %v4077_v11 = vld [vmem:[#allocation5 + $0x3e0] ss:$40 sps:$4 sm:$0xff]   ;;  %v4082_v12 = vld [vmem:[#allocation5 + $0x6ac] ss:$40 sps:$4 sm:$0xff]  }
 0x125   :  { %2875 = vmatpush1.bf16.msra.mxu1 %v3999_v15  ;;  %v4080_v15 = vld [vmem:[#allocation5 + $0x6a8] ss:$40 sps:$4 sm:$0xff]  }
 0x126   :  { %2832 = vmatpush1.bf16.msra.mxu0 %v3996_v13  ;;  %2876 = vmatprep.subr.bf16.mxu1 %v4004_v16  ;;  %v4085_v13 = vld [vmem:[#allocation5 + $0x434] ss:$40 sps:$4 sm:$0xff]   ;;  %v4083_v16 = vld [vmem:[#allocation5 + $0x430] ss:$40 sps:$4 sm:$0xff]  }
 0x127   :  { %2989 = vmatprep.subr.bf16.mxu0 %v4007_v17  ;;  %v4088_v17 = vld [vmem:[#allocation5 + $0x6fc] ss:$40 sps:$4 sm:$0xff]  }
 0x129   :  { %2850 = vmatmul.mubr.bf16.vlgmr.msra.gmra.mrb[4].mxu0 %v4376_v22  ;;  %2877 = vmatpush1.bf16.msra.mxu1 %v4002_v18  ;;  %v4091_v18 = vld [vmem:[#allocation5 + $0x484] ss:$40 sps:$4 sm:$0xff]  }
 0x12a   :  { %2990 = vmatpush1.bf16.msra.mxu0 %v4005_v19  ;;  %2878 = vmatprep.subr.bf16.mxu1 %v4010_v20 }
 0x12b   :  { %2991 = vmatprep.subr.bf16.mxu0 %v4013_v21  ;;  %3021 = vmatprep.mubr.bf16.mxu0 %v4373_v58  ;;  %v4050_v58 = vld [vmem:[#allocation5 + $0x518] ss:$40 sps:$4 sm:$0xff]  }
 0x12d   :  { %2879 = vmatpush1.bf16.msra.mxu1 %v4008_v23 }
 0x12e   :  { %2992 = vmatpush1.bf16.msra.mxu0 %v4011_v24  ;;  %2880 = vmatprep.subr.bf16.mxu1 %v4016_v25  ;;  %v4086_v25 = vld [vmem:[#allocation5 + $0x6f8] ss:$40 sps:$4 sm:$0xff]  }
 0x12f   :  { %2993 = vmatprep.subr.bf16.mxu0 %v4019_v26  ;;  %v4089_v26 = vld [vmem:[#allocation5 + $0x480] ss:$40 sps:$4 sm:$0xff]  }
 0x131   :  { %2881 = vmatpush1.bf16.msra.mxu1 %v4014_v27 }
 0x132   :  { %2994 = vmatpush1.bf16.msra.mxu0 %v4017_v7  ;;  %2882 = vmatprep.subr.bf16.mxu1 %v4022_v28  ;;  %v4094_v28 = vld [vmem:[#allocation5 + $0x74c] ss:$40 sps:$4 sm:$0xff]  }
 0x133   :  { %2995 = vmatprep.subr.bf16.mxu0 %v4025_v29  ;;  %v4097_v29 = vld [vmem:[#allocation5 + $0x4d4] ss:$40 sps:$4 sm:$0xff]  }
 0x135   :  { %2883 = vmatpush1.bf16.msra.mxu1 %v4020_v30 }
 0x136   :  { %2996 = vmatpush1.bf16.msra.mxu0 %v4023_v31  ;;  %2884 = vmatprep.subr.bf16.mxu1 %v4028_v32  ;;  %v4092_v31 = vld [vmem:[#allocation5 + $0x748] ss:$40 sps:$4 sm:$0xff]  }
 0x137   :  { %2997 = vmatprep.subr.bf16.mxu0 %v4031_v33  ;;  %v4095_v32 = vld [vmem:[#allocation5 + $0x4d0] ss:$40 sps:$4 sm:$0xff]   ;;  %v4100_v33 = vld [vmem:[#allocation5 + $0x79c] ss:$40 sps:$4 sm:$0xff]  }
 0x139   :  { %2885 = vmatpush1.bf16.msra.mxu1 %v4026_v34  ;;  %v4103_v34 = vld [vmem:[#allocation5 + $0x524] ss:$40 sps:$4 sm:$0xff]  }
 0x13a   :  { %2998 = vmatpush1.bf16.msra.mxu0 %v4029_v35  ;;  %2886 = vmatprep.subr.bf16.mxu1 %v4034_v36  ;;  %v4098_v35 = vld [vmem:[#allocation5 + $0x798] ss:$40 sps:$4 sm:$0xff]  }
 0x13b   :  { %2999 = vmatprep.subr.bf16.mxu0 %v4037_v37  ;;  %v4380_v43 = vpop.f32.mrb[0].mxu1  ;;  %v4101_v36 = vld [vmem:[#allocation5 + $0x520] ss:$40 sps:$4 sm:$0xff]   ;;  %v4106_v37 = vld [vmem:[#allocation5 + $0x7ec] ss:$40 sps:$4 sm:$0xff]  }
 0x13c   :  { %v4382_v44 = vpop.f32.mrb[1].mxu1 }
 0x13d   :  { %2887 = vmatpush1.bf16.msra.mxu1 %v4032_v38  ;;  %v4384_v47 = vpop.f32.mrb[2].mxu1  ;;  %v4109_v38 = vld [vmem:[#allocation5 + $0x574] ss:$40 sps:$4 sm:$0xff]  }
 0x13e   :  { %3000 = vmatpush1.bf16.msra.mxu0 %v4035_v40  ;;  %2888 = vmatprep.subr.bf16.mxu1 %v4040_v41  ;;  %v4386_v52 = vpop.f32.mrb[3].mxu1  ;;  %v4104_v40 = vld [vmem:[#allocation5 + $0x7e8] ss:$40 sps:$4 sm:$0xff]  }
 0x13f   :  { %3001 = vmatprep.subr.bf16.mxu0 %v4043_v42  ;;  %v4107_v41 = vld [vmem:[#allocation5 + $0x570] ss:$40 sps:$4 sm:$0xff]   ;;  %v4112_v42 = vld [vmem:[#allocation5 + $0x83c] ss:$40 sps:$4 sm:$0xff]  }
 0x141   :  { %2889 = vmatpush1.bf16.msra.mxu1 %v4038_v45  ;;  %v4113_v45 = vld [vmem:[#allocation5 + $0x5c0] ss:$40 sps:$4 sm:$0xff]  }
 0x142   :  { %3002 = vmatpush1.bf16.msra.mxu0 %v4041_v46  ;;  %2890 = vmatprep.subr.bf16.mxu1 %v4046_v50  ;;  %v4118_v46 = vld [vmem:[#allocation5 + $0x88c] ss:$40 sps:$4 sm:$0xff]   ;;  %v4116_v50 = vld [vmem:[#allocation5 + $0x888] ss:$40 sps:$4 sm:$0xff]  }
 0x143   :  { %3003 = vmatprep.subr.bf16.mxu0 %v4049_v51  ;;  %v4119_v51 = vld [vmem:[#allocation5 + $0x610] ss:$40 sps:$4 sm:$0xff]  }
 0x145   :  { %2891 = vmatpush1.bf16.msra.mxu1 %v4044_v54  ;;  %v4127_v54 = vld [vmem:[#allocation5 + $0x664] ss:$40 sps:$4 sm:$0xff]  }
 0x146   :  { %3004 = vmatpush1.bf16.msra.mxu0 %v4047_v55  ;;  %2903 = vmatprep.subr.bf16.mxu1 %v4052_v56  ;;  %v4122_v55 = vld [vmem:[#allocation5 + $0x8d8] ss:$40 sps:$4 sm:$0xff]  }
 0x147   :  { %3005 = vmatprep.subr.bf16.mxu0 %v4055_v57  ;;  %v4125_v56 = vld [vmem:[#allocation5 + $0x660] ss:$40 sps:$4 sm:$0xff]   ;;  %v4130_v57 = vld [vmem:[#allocation5 + $0x92c] ss:$40 sps:$4 sm:$0xff]  }
 0x148   :  { %2893 = vmatmul.mubr.bf16.vlgmr.msra.gmra.mrb[8].mxu1 %v4388_v59 }
 0x149   :  { %2904 = vmatpush1.bf16.msra.mxu1 %v4050_v58  ;;  %2935 = vmatprep.mubr.bf16.mxu1 %v4391_v63  ;;  %v4133_v58 = vld [vmem:[#allocation5 + $0x6b4] ss:$40 sps:$4 sm:$0xff]  }
 0x14a   :  { %3006 = vmatpush1.bf16.msra.mxu0 %v4053_v48  ;;  %2905 = vmatprep.subr.bf16.mxu1 %v4058_v39  ;;  %v4128_v48 = vld [vmem:[#allocation5 + $0x928] ss:$40 sps:$4 sm:$0xff]  }
 0x14b   :  { %3007 = vmatprep.subr.bf16.mxu0 %v4061_v6  ;;  %v4131_v39 = vld [vmem:[#allocation5 + $0x6b0] ss:$40 sps:$4 sm:$0xff]   ;;  %v4136_v6 = vld [vmem:[#allocation5 + $0x97c] ss:$40 sps:$4 sm:$0xff]  }
 0x14d   :  { %2906 = vmatpush1.bf16.msra.mxu1 %v4056_v60  ;;  %v4134_v60 = vld [vmem:[#allocation5 + $0x978] ss:$40 sps:$4 sm:$0xff]  }
 0x14e   :  { %3008 = vmatpush1.bf16.msra.mxu0 %v4059_v61  ;;  %2907 = vmatprep.subr.bf16.mxu1 %v4064_v49  ;;  %v4137_v61 = vld [vmem:[#allocation5 + $0x700] ss:$40 sps:$4 sm:$0xff]   ;;  %v4142_v49 = vld [vmem:[#allocation5 + $0x9cc] ss:$40 sps:$4 sm:$0xff]  }
 0x14f   :  { %3009 = vmatprep.subr.bf16.mxu0 %v4067_v62  ;;  %v4145_v62 = vld [vmem:[#allocation5 + $0x754] ss:$40 sps:$4 sm:$0xff]  }
 0x151   :  { %2908 = vmatpush1.bf16.msra.mxu1 %v4062_v0  ;;  %v4143_v0 = vld [vmem:[#allocation5 + $0x750] ss:$40 sps:$4 sm:$0xff]  }
 0x152   :  { %3010 = vmatpush1.bf16.msra.mxu0 %v4065_v1  ;;  %2909 = vmatprep.subr.bf16.mxu1 %v4070_v2  ;;  %v4148_v1 = vld [vmem:[#allocation5 + $0xa1c] ss:$40 sps:$4 sm:$0xff]  }
 0x153   :  { %3011 = vmatprep.subr.bf16.mxu0 %v4073_v3  ;;  %v4151_v2 = vld [vmem:[#allocation5 + $0x7a4] ss:$40 sps:$4 sm:$0xff]   ;;  %v4146_v3 = vld [vmem:[#allocation5 + $0xa18] ss:$40 sps:$4 sm:$0xff]  }
 0x155   :  { %2910 = vmatpush1.bf16.msra.mxu1 %v4068_v4  ;;  %v4149_v4 = vld [vmem:[#allocation5 + $0x7a0] ss:$40 sps:$4 sm:$0xff]  }
 0x156   :  { %3012 = vmatpush1.bf16.msra.mxu0 %v4071_v5  ;;  %2911 = vmatprep.subr.bf16.mxu1 %v4076_v8  ;;  %v4154_v5 = vld [vmem:[#allocation5 + $0xa6c] ss:$40 sps:$4 sm:$0xff]  }
 0x157   :  { %3013 = vmatprep.subr.bf16.mxu0 %v4079_v9  ;;  %v4157_v8 = vld [vmem:[#allocation5 + $0x7f4] ss:$40 sps:$4 sm:$0xff]   ;;  %v4152_v9 = vld [vmem:[#allocation5 + $0xa68] ss:$40 sps:$4 sm:$0xff]  }
 0x159   :  { %2912 = vmatpush1.bf16.msra.mxu1 %v4074_v10  ;;  %v4155_v10 = vld [vmem:[#allocation5 + $0x7f0] ss:$40 sps:$4 sm:$0xff]  }
 0x15a   :  { %3014 = vmatpush1.bf16.msra.mxu0 %v4077_v11  ;;  %2913 = vmatprep.subr.bf16.mxu1 %v4082_v12  ;;  %v4160_v11 = vld [vmem:[#allocation5 + $0xabc] ss:$40 sps:$4 sm:$0xff]  }
 0x15b   :  { %3015 = vmatprep.subr.bf16.mxu0 %v4085_v13  ;;  %v4163_v12 = vld [vmem:[#allocation5 + $0x844] ss:$40 sps:$4 sm:$0xff]   ;;  %v4158_v13 = vld [vmem:[#allocation5 + $0xab8] ss:$40 sps:$4 sm:$0xff]  }
 0x15c   :  { %v2593_v19 = vpop.f32.mrb[0].mxu0 }
 0x15d   :  { %v3561_v20 = vadd.f32 %v2593_v19, %v4380_v43  ;;  %v2595_v21 = vpop.f32.mrb[1].mxu0  ;;  %2914 = vmatpush1.bf16.msra.mxu1 %v4080_v15  ;;  %v4115_v43 = vld [vmem:[#allocation5 + $0x5c4] ss:$40 sps:$4 sm:$0xff]   ;;  %v4161_v15 = vld [vmem:[#allocation5 + $0x840] ss:$40 sps:$4 sm:$0xff]  }
 0x15e   :  { %v3562_v23 = vadd.f32 %v2595_v21, %v4382_v44  ;;  %v2597_v24 = vpop.f32.mrb[2].mxu0  ;;  %3016 = vmatpush1.bf16.msra.mxu0 %v4083_v16  ;;  %2915 = vmatprep.subr.bf16.mxu1 %v4088_v17  ;;  %v4110_v44 = vld [vmem:[#allocation5 + $0x838] ss:$40 sps:$4 sm:$0xff]   ;;  %v4166_v16 = vld [vmem:[#allocation5 + $0xb0c] ss:$40 sps:$4 sm:$0xff]  }
 0x15f   :  { %3118 = vst [vmem:[#allocation7] sm:$0xff] %v3561_v20  ;;  %v3563_v27 = vadd.f32 %v2597_v24, %v4384_v47  ;;  %v2599_v7 = vpop.f32.mrb[3].mxu0  ;;  %3017 = vmatprep.subr.bf16.mxu0 %v4091_v18  ;;  %v4121_v47 = vld [vmem:[#allocation5 + $0x614] ss:$40 sps:$4 sm:$0xff]   ;;  %v4164_v18 = vld [vmem:[#allocation5 + $0xb08] ss:$40 sps:$4 sm:$0xff]  }
 0x160   :  { %3119 = vst [vmem:[#allocation7 + $0x8] sm:$0xff] %v3562_v23  ;;  %v3564_v30 = vadd.f32 %v2599_v7, %v4386_v52  ;;  %v4124_v52 = vld [vmem:[#allocation5 + $0x8dc] ss:$40 sps:$4 sm:$0xff]   ;;  %v4167_v19 = vld [vmem:[#allocation5 + $0x890] ss:$40 sps:$4 sm:$0xff]  }
 0x161   :  { %3128 = vst [vmem:[#allocation7 + $0x50] sm:$0xff] %v3563_v27  ;;  %2916 = vmatpush1.bf16.msra.mxu1 %v4086_v25  ;;  %v4169_v17 = vld [vmem:[#allocation5 + $0x894] ss:$40 sps:$4 sm:$0xff]   ;;  %v4175_v21 = vld [vmem:[#allocation5 + $0x8e4] ss:$40 sps:$4 sm:$0xff]  }
 0x162   :  { %3129 = vst [vmem:[#allocation7 + $0x58] sm:$0xff] %v3564_v30  ;;  %3018 = vmatpush1.bf16.msra.mxu0 %v4089_v26  ;;  %2917 = vmatprep.subr.bf16.mxu1 %v4094_v28  ;;  %v4172_v20 = vld [vmem:[#allocation5 + $0xb5c] ss:$40 sps:$4 sm:$0xff]   ;;  %v4170_v23 = vld [vmem:[#allocation5 + $0xb58] ss:$40 sps:$4 sm:$0xff]  }
 0x163   :  { %3019 = vmatprep.subr.bf16.mxu0 %v4097_v29  ;;  %v4173_v24 = vld [vmem:[#allocation5 + $0x8e0] ss:$40 sps:$4 sm:$0xff]   ;;  %v4178_v25 = vld [vmem:[#allocation5 + $0xbac] ss:$40 sps:$4 sm:$0xff]   ;;  %v4179_v7 = vld [vmem:[#allocation5 + $0x930] ss:$40 sps:$4 sm:$0xff]  }
 0x164   :  { %v4181_v26 = vld [vmem:[#allocation5 + $0x934] ss:$40 sps:$4 sm:$0xff]   ;;  %v4176_v27 = vld [vmem:[#allocation5 + $0xba8] ss:$40 sps:$4 sm:$0xff]   ;;  %v4187_v29 = vld [vmem:[#allocation5 + $0x984] ss:$40 sps:$4 sm:$0xff]  }
 0x165   :  { %2918 = vmatpush1.bf16.msra.mxu1 %v4092_v31  ;;  %v4184_v28 = vld [vmem:[#allocation5 + $0xbfc] ss:$40 sps:$4 sm:$0xff]   ;;  %v4182_v30 = vld [vmem:[#allocation5 + $0xbf8] ss:$40 sps:$4 sm:$0xff]  }
 0x166   :  { %3020 = vmatpush1.bf16.msra.mxu0 %v4095_v32  ;;  %2919 = vmatprep.subr.bf16.mxu1 %v4100_v33  ;;  %v4185_v31 = vld [vmem:[#allocation5 + $0x980] ss:$40 sps:$4 sm:$0xff]   ;;  %v4190_v32 = vld [vmem:[#allocation5 + $0xc4c] ss:$40 sps:$4 sm:$0xff]  }
 0x167   :  { %3032 = vmatprep.subr.bf16.mxu0 %v4103_v34  ;;  %v4193_v33 = vld [vmem:[#allocation5 + $0x9d4] ss:$40 sps:$4 sm:$0xff]   ;;  %v4188_v34 = vld [vmem:[#allocation5 + $0xc48] ss:$40 sps:$4 sm:$0xff]  }
 0x169   :  { %3022 = vmatmul.mubr.bf16.vlgmr.msra.gmra.mrb[8].mxu0 %v4388_v59  ;;  %2920 = vmatpush1.bf16.msra.mxu1 %v4098_v35  ;;  %v4139_v59 = vld [vmem:[#allocation5 + $0x704] ss:$40 sps:$4 sm:$0xff]   ;;  %v4191_v35 = vld [vmem:[#allocation5 + $0x9d0] ss:$40 sps:$4 sm:$0xff]  }
 0x16a   :  { %3033 = vmatpush1.bf16.msra.mxu0 %v4101_v36  ;;  %2921 = vmatprep.subr.bf16.mxu1 %v4106_v37  ;;  %v4196_v36 = vld [vmem:[#allocation5 + $0xa24] ss:$40 sps:$4 sm:$0xff]   ;;  %v4194_v37 = vld [vmem:[#allocation5 + $0xa20] ss:$40 sps:$4 sm:$0xff]  }
 0x16b   :  { %3034 = vmatprep.subr.bf16.mxu0 %v4109_v38  ;;  %3064 = vmatprep.mubr.bf16.mxu0 %v4391_v63  ;;  %v4140_v63 = vld [vmem:[#allocation5 + $0x9c8] ss:$40 sps:$4 sm:$0xff]   ;;  %v4199_v38 = vld [vmem:[#allocation5 + $0xa74] ss:$40 sps:$4 sm:$0xff]  }
 0x16d   :  { %2922 = vmatpush1.bf16.msra.mxu1 %v4104_v40  ;;  %v4197_v40 = vld [vmem:[#allocation5 + $0xa70] ss:$40 sps:$4 sm:$0xff]  }
 0x16e   :  { %3035 = vmatpush1.bf16.msra.mxu0 %v4107_v41  ;;  %2923 = vmatprep.subr.bf16.mxu1 %v4112_v42  ;;  %v4202_v41 = vld [vmem:[#allocation5 + $0xac4] ss:$40 sps:$4 sm:$0xff]   ;;  %v4200_v42 = vld [vmem:[#allocation5 + $0xac0] ss:$40 sps:$4 sm:$0xff]  }
 0x16f   :  { %3036 = vmatprep.subr.bf16.mxu0 %v4115_v43  ;;  %v4205_v43 = vld [vmem:[#allocation5 + $0xb14] ss:$40 sps:$4 sm:$0xff]  }
 0x171   :  { %2924 = vmatpush1.bf16.msra.mxu1 %v4110_v44  ;;  %v4203_v44 = vld [vmem:[#allocation5 + $0xb10] ss:$40 sps:$4 sm:$0xff]  }
 0x172   :  { %3037 = vmatpush1.bf16.msra.mxu0 %v4113_v45  ;;  %2925 = vmatprep.subr.bf16.mxu1 %v4118_v46  ;;  %v4208_v45 = vld [vmem:[#allocation5 + $0xb64] ss:$40 sps:$4 sm:$0xff]   ;;  %v4206_v46 = vld [vmem:[#allocation5 + $0xb60] ss:$40 sps:$4 sm:$0xff]  }
 0x173   :  { %3038 = vmatprep.subr.bf16.mxu0 %v4121_v47  ;;  %v4211_v47 = vld [vmem:[#allocation5 + $0xbb4] ss:$40 sps:$4 sm:$0xff]  }
 0x175   :  { %2926 = vmatpush1.bf16.msra.mxu1 %v4116_v50  ;;  %v4214_v50 = vld [vmem:[#allocation5 + $0xc04] ss:$40 sps:$4 sm:$0xff]  }
 0x176   :  { %3039 = vmatpush1.bf16.msra.mxu0 %v4119_v51  ;;  %2927 = vmatprep.subr.bf16.mxu1 %v4124_v52  ;;  %v4217_v51 = vld [vmem:[#allocation5 + $0xc54] ss:$40 sps:$4 sm:$0xff]   ;;  %v4215_v52 = vld [vmem:[#allocation5 + $0xc50] ss:$40 sps:$4 sm:$0xff]  }
 0x177   :  { %3040 = vmatprep.subr.bf16.mxu0 %v4127_v54 }
 0x179   :  { %2928 = vmatpush1.bf16.msra.mxu1 %v4122_v55 }
 0x17a   :  { %3041 = vmatpush1.bf16.msra.mxu0 %v4125_v56  ;;  %2929 = vmatprep.subr.bf16.mxu1 %v4130_v57 }
 0x17b   :  { %3042 = vmatprep.subr.bf16.mxu0 %v4133_v58 }
 0x17d   :  { %2930 = vmatpush1.bf16.msra.mxu1 %v4128_v48 }
 0x17e   :  { %3043 = vmatpush1.bf16.msra.mxu0 %v4131_v39  ;;  %2931 = vmatprep.subr.bf16.mxu1 %v4136_v6 }
 0x17f   :  { %3044 = vmatprep.subr.bf16.mxu0 %v4139_v59 }
 0x181   :  { %2932 = vmatpush1.bf16.msra.mxu1 %v4134_v60 }
 0x182   :  { %3045 = vmatpush1.bf16.msra.mxu0 %v4137_v61  ;;  %2933 = vmatprep.subr.bf16.mxu1 %v4142_v49 }
 0x183   :  { %3046 = vmatprep.subr.bf16.mxu0 %v4145_v62 }
 0x185   :  { %2934 = vmatpush1.bf16.msra.mxu1 %v4140_v63 }
 0x186   :  { %3047 = vmatpush1.bf16.msra.mxu0 %v4143_v0  ;;  %2946 = vmatprep.subr.bf16.mxu1 %v4148_v1 }
 0x187   :  { %3048 = vmatprep.subr.bf16.mxu0 %v4151_v2 }
 0x188   :  { %2936 = vmatmul.mubr.bf16.vlgmr.msra.gmra.mrb[8].mxu1 %v4369_v53 }
 0x189   :  { %2947 = vmatpush1.bf16.msra.mxu1 %v4146_v3  ;;  %2978 = vmatprep.mubr.bf16.mxu1 %v4301_v14 }
 0x18a   :  { %3049 = vmatpush1.bf16.msra.mxu0 %v4149_v4  ;;  %2948 = vmatprep.subr.bf16.mxu1 %v4154_v5 }
 0x18b   :  { %3050 = vmatprep.subr.bf16.mxu0 %v4157_v8 }
 0x18d   :  { %2949 = vmatpush1.bf16.msra.mxu1 %v4152_v9 }
 0x18e   :  { %3051 = vmatpush1.bf16.msra.mxu0 %v4155_v10  ;;  %2950 = vmatprep.subr.bf16.mxu1 %v4160_v11 }
 0x18f   :  { %3052 = vmatprep.subr.bf16.mxu0 %v4163_v12 }
 0x191   :  { %2951 = vmatpush1.bf16.msra.mxu1 %v4158_v13 }
 0x192   :  { %3053 = vmatpush1.bf16.msra.mxu0 %v4161_v15  ;;  %2952 = vmatprep.subr.bf16.mxu1 %v4166_v16 }
 0x193   :  { %3054 = vmatprep.subr.bf16.mxu0 %v4169_v17 }
 0x195   :  { %2953 = vmatpush1.bf16.msra.mxu1 %v4164_v18 }
 0x196   :  { %3055 = vmatpush1.bf16.msra.mxu0 %v4167_v19  ;;  %2954 = vmatprep.subr.bf16.mxu1 %v4172_v20 }
 0x197   :  { %3056 = vmatprep.subr.bf16.mxu0 %v4175_v21 }
 0x199   :  { %2955 = vmatpush1.bf16.msra.mxu1 %v4170_v23 }
 0x19a   :  { %3057 = vmatpush1.bf16.msra.mxu0 %v4173_v24  ;;  %2956 = vmatprep.subr.bf16.mxu1 %v4178_v25 }
 0x19b   :  { %3058 = vmatprep.subr.bf16.mxu0 %v4181_v26 }
 0x19d   :  { %2957 = vmatpush1.bf16.msra.mxu1 %v4176_v27 }
 0x19e   :  { %3059 = vmatpush1.bf16.msra.mxu0 %v4179_v7  ;;  %2958 = vmatprep.subr.bf16.mxu1 %v4184_v28 }
 0x19f   :  { %3060 = vmatprep.subr.bf16.mxu0 %v4187_v29 }
 0x1a1   :  { %2959 = vmatpush1.bf16.msra.mxu1 %v4182_v30 }
 0x1a2   :  { %3061 = vmatpush1.bf16.msra.mxu0 %v4185_v31  ;;  %2960 = vmatprep.subr.bf16.mxu1 %v4190_v32 }
 0x1a3   :  { %3062 = vmatprep.subr.bf16.mxu0 %v4193_v33 }
 0x1a5   :  { %2961 = vmatpush1.bf16.msra.mxu1 %v4188_v34 }
 0x1a6   :  { %3063 = vmatpush1.bf16.msra.mxu0 %v4191_v35 }
 0x1a7   :  { %3075 = vmatprep.subr.bf16.mxu0 %v4196_v36 }
 0x1a8   :  { %2979 = vmatmul.mubr.bf16.vlgmr.msra.gmra.mrb[8].mxu1 %v4376_v22 }
 0x1a9   :  { %3065 = vmatmul.mubr.bf16.vlgmr.msra.gmra.mrb[8].mxu0 %v4369_v53  ;;  %v4209_v53 = vld [vmem:[#allocation5 + $0xbb0] ss:$40 sps:$4 sm:$0xff]  }
 0x1aa   :  { %3076 = vmatpush1.bf16.msra.mxu0 %v4194_v37  ;;  %3107 = vmatprep.mubr.bf16.mxu0 %v4301_v14  ;;  %v4212_v14 = vld [vmem:[#allocation5 + $0xc00] ss:$40 sps:$4 sm:$0xff]  }
 0x1ab   :  { %3077 = vmatprep.subr.bf16.mxu0 %v4199_v38 }
 0x1ae   :  { %3078 = vmatpush1.bf16.msra.mxu0 %v4197_v40 }
 0x1af   :  { %3079 = vmatprep.subr.bf16.mxu0 %v4202_v41 }
 0x1b2   :  { %3080 = vmatpush1.bf16.msra.mxu0 %v4200_v42 }
 0x1b3   :  { %3081 = vmatprep.subr.bf16.mxu0 %v4205_v43 }
 0x1b6   :  { %3082 = vmatpush1.bf16.msra.mxu0 %v4203_v44 }
 0x1b7   :  { %3083 = vmatprep.subr.bf16.mxu0 %v4208_v45 }
 0x1ba   :  { %3084 = vmatpush1.bf16.msra.mxu0 %v4206_v46 }
 0x1bb   :  { %3085 = vmatprep.subr.bf16.mxu0 %v4211_v47 }
 0x1be   :  { %3086 = vmatpush1.bf16.msra.mxu0 %v4209_v53 }
 0x1bf   :  { %3087 = vmatprep.subr.bf16.mxu0 %v4214_v50 }
 0x1c2   :  { %3088 = vmatpush1.bf16.msra.mxu0 %v4212_v14 }
 0x1c3   :  { %3089 = vmatprep.subr.bf16.mxu0 %v4217_v51 }
 0x1c6   :  { %3090 = vmatpush1.bf16.msra.mxu0 %v4215_v52 }
 0x1c9   :  { %3108 = vmatmul.mubr.bf16.vlgmr.msra.gmra.mrb[8].mxu0 %v4376_v22 }
 0x1db   :  { %v2722_v54 = vpop.f32.mrb[4].mxu1 }
 0x1dc   :  { %3120 = vst [vmem:[#allocation7 + $0x10] sm:$0xff] %v2722_v54  ;;  %v2724_v55 = vpop.f32.mrb[5].mxu1 }
 0x1dd   :  { %3121 = vst [vmem:[#allocation7 + $0x18] sm:$0xff] %v2724_v55  ;;  %v2726_v56 = vpop.f32.mrb[6].mxu1 }
 0x1de   :  { %3130 = vst [vmem:[#allocation7 + $0x60] sm:$0xff] %v2726_v56  ;;  %v2728_v57 = vpop.f32.mrb[7].mxu1 }
 0x1df   :  { %3131 = vst [vmem:[#allocation7 + $0x68] sm:$0xff] %v2728_v57 }
 0x1fc   :  { %v2851_v58 = vpop.f32.mrb[4].mxu0 }
 0x1fd   :  { %3122 = vst [vmem:[#allocation7 + $0x20] sm:$0xff] %v2851_v58  ;;  %v2853_v48 = vpop.f32.mrb[5].mxu0 }
 0x1fe   :  { %3123 = vst [vmem:[#allocation7 + $0x28] sm:$0xff] %v2853_v48  ;;  %v2855_v39 = vpop.f32.mrb[6].mxu0 }
 0x1ff   :  { %3132 = vst [vmem:[#allocation7 + $0x70] sm:$0xff] %v2855_v39  ;;  %v2857_v6 = vpop.f32.mrb[7].mxu0 }
 0x200   :  { %3133 = vst [vmem:[#allocation7 + $0x78] sm:$0xff] %v2857_v6 }
 0x27b   :  { %v2980_v59 = vpop.f32.mrb[8].mxu1 }
 0x27c   :  { %3124 = vst [vmem:[#allocation7 + $0x30] sm:$0xff] %v2980_v59  ;;  %v2982_v60 = vpop.f32.mrb[9].mxu1 }
 0x27d   :  { %3125 = vst [vmem:[#allocation7 + $0x38] sm:$0xff] %v2982_v60  ;;  %v2984_v22 = vpop.f32.mrb[10].mxu1 }
 0x27e   :  { %3134 = vst [vmem:[#allocation7 + $0x80] sm:$0xff] %v2984_v22  ;;  %v2986_v61 = vpop.f32.mrb[11].mxu1 }
 0x27f   :  { %3135 = vst [vmem:[#allocation7 + $0x88] sm:$0xff] %v2986_v61 }
 0x29c   :  { %v3109_v49 = vpop.f32.mrb[8].mxu0 }
 0x29d   :  { %3126 = vst [vmem:[#allocation7 + $0x40] sm:$0xff] %v3109_v49  ;;  %v3111_v62 = vpop.f32.mrb[9].mxu0 }
 0x29e   :  { %3127 = vst [vmem:[#allocation7 + $0x48] sm:$0xff] %v3111_v62  ;;  %v3113_v63 = vpop.f32.mrb[10].mxu0 }
 0x29f   :  { %3136 = vst [vmem:[#allocation7 + $0x90] sm:$0xff] %v3113_v63  ;;  %v3115_v0 = vpop.f32.mrb[11].mxu0 }
 0x2a0   :  { %3137 = vst [vmem:[#allocation7 + $0x98] sm:$0xff] %v3115_v0 }
 0x2a1   :  { %4278 = shalt.err (!%p4275_p6)
}
 0x2a2   :  { %s4279_s12 = scalar_lea.hbm %s4420_s2, 2560 }
 0x2a3   :  { %p4280_p7 = scmp.ne.s32.totalorder %s4420_s2, %s4279_s12  ;;  %p4283_p8 = scmp.lt.u32.totalorder %s4279_s12, %s4420_s2 }
 0x2a5   :  { %p4285_p9 = pnand %p4283_p8, %p4280_p7 }
 0x2a7   :  { %4288 = shalt.err (!%p4285_p9)
}
 0x2a8   :  { %s4303_s17 = smov 1280   ;;  %s4304_s18 = smov 80  }
 0x2a9   :  { %3149 = dma.vmem_to_hbm [thread:$0]  %s3144_s8, 2560, %s4420_s2, [#allocation4], %s4303_s17, %s4303_s17, %s4304_s18  }
 0x2aa   :  { %4293 = dma.done.wait [#allocation4], 2560  }
 0x2ab   :  { %4294 = vsyncadd [#allocation4], 4294964736 }
 0x2ac   :  { %3153 = vsyncpa [#allocation3], 1 }
 0x2ad   :  { %3154 = vsyncpa [#allocation6], 1 }
 0x2ae   :  { %3155 = vsyncpa [#allocation4], 1 }

</bundles_post_ra>
